<compile_context>
chip_gen: v5e
topology: v5e:2x2
jax: 0.10.0
libtpu: 0.0.40
codegen_flags: <defaults>
</compile_context>

<pallas_src>
import math

import jax
import jax.numpy as jnp
from jax.experimental import pallas as pl
from jax.experimental.pallas import tpu as pltpu

LANE = 128


def _round_up(n, m=LANE):
    return ((n + m - 1) // m) * m


def _pick_tb(B, S, target_rows=512):
    """Largest divisor TB of B with TB*S <= target_rows (batch folding)."""
    cands = [tb for tb in range(1, B + 1)
             if B % tb == 0 and tb * S <= max(target_rows, S)]
    if not cands:
        return 1
    tb = max(cands)
    # If folding collapses the grid to a single step, prefer a smaller TB that
    # still gives >=128 rows so both v7x TensorCores get work.
    if B // tb == 1:
        alt = [t for t in cands if t < tb and B // t >= 2 and t * S >= 128]
        if alt:
            tb = max(alt)
    return tb


# ----------------------------- kernel ---------------------------------------


def make_kernel(S, TB, Ct, tcn_dim, level_meta):
    R = TB * S  # rows of the flattened (batch*time) view

    def kernel(x_ref, wp_ref, pe_ref, *rest):
        # rest = per level: [w1p, b1, w2p, b2, (wd, bd if downsample)], ln_g, ln_b, out_ref

        # ---- input projection + (bias + positional encoding), pe pre-tiled to R rows
        x = x_ref[...].reshape(R, x_ref.shape[-1])
        h = (jnp.dot(x, wp_ref[...], preferred_element_type=jnp.float32)
             + pe_ref[...])                                        # (R, Cp0)

        # ---- hoisted causal-shift masks: one per unique shift, reused everywhere
        row_t = jax.lax.broadcasted_iota(jnp.int32, (R, 1), 0) % S
        uniq = sorted({s for lm in level_meta for s in lm["shifts"] if s > 0})
        masks = {s: (row_t >= s).astype(jnp.float32) for s in uniq}

        def shifted(a, s):
            # a[t] -> a[t - s] within each batch element, zeros for t < s.
            # Rolling the flattened (TB*S, C) view only leaks rows that the
            # per-time mask zeroes out, so batch boundaries stay causal.
            if s == 0:
                return a
            return pltpu.roll(a, shift=s, axis=0) * masks[s]

        def conv(a, shifts, w_ref, b_ref):
            # Fused K-tap causal dilated conv: lane-concat the shifted
            # activations and do a single MXU matmul against the packed weight.
            parts = [shifted(a, s) for s in shifts]
            cat = parts[0] if len(parts) == 1 else jnp.concatenate(parts, axis=-1)
            return (jnp.dot(cat, w_ref[...], preferred_element_type=jnp.float32)
                    + b_ref[...])

        # ---- TCN blocks ----
        idx = 0
        for lm in level_meta:
            shifts = lm["shifts"]
            w1, b1, w2, b2 = rest[idx], rest[idx + 1], rest[idx + 2], rest[idx + 3]
            idx += 4
            if lm["has_down"]:
                wd, bd = rest[idx], rest[idx + 1]
                idx += 2
            out1 = jnp.maximum(conv(h, shifts, w1, b1), 0.0)       # conv1 + ReLU
            out2 = jnp.maximum(conv(out1, shifts, w2, b2), 0.0)    # conv2 + ReLU
            if lm["has_down"]:
                res = (jnp.dot(h, wd[...], preferred_element_type=jnp.float32)
                       + bd[...])
            else:
                res = h
            h = jnp.maximum(out2 + res, 0.0)                       # residual + ReLU

        # ---- LayerNorm over the real tcn_dim channels (padded lanes of h are 0)
        ln_g, ln_b, out_ref = rest[idx], rest[idx + 1], rest[idx + 2]
        inv_n = 1.0 / float(tcn_dim)
        mean = jnp.sum(h, axis=-1, keepdims=True) * inv_n
        lane = jax.lax.broadcasted_iota(jnp.int32, (1, Ct), 1)
        cmask = (lane < tcn_dim).astype(jnp.float32)
        d = (h - mean) * cmask                                     # re-zero padded lanes
        var = jnp.sum(d * d, axis=-1, keepdims=True) * inv_n       # biased var (PyTorch LN)
        y = d * jax.lax.rsqrt(var + 1e-5) * ln_g[...] + ln_b[...]
        out_ref[...] = y.reshape(TB, S, Ct).astype(out_ref.dtype)

    return kernel


# ----------------------------- wrapper ---------------------------------------


def per_sensor_encoder_tcn(x, params, *, num_levels, kernel_size, proj_dim, tcn_dim):
    B, S, Din = x.shape
    K = kernel_size
    Cp0 = _round_up(proj_dim)     # lane-padded projection width
    Ct = _round_up(tcn_dim)       # lane-padded TCN width
    TB = _pick_tb(B, S)

    def padc(a, rows=None, cols=None):
        r = a.shape[0] if rows is None else rows
        c = a.shape[1] if cols is None else cols
        return jnp.pad(a, ((0, r - a.shape[0]), (0, c - a.shape[1])))

    inputs, in_specs = [], []

    def add_full(arr):
        inputs.append(arr)
        n = arr.ndim
        in_specs.append(pl.BlockSpec(arr.shape, lambda b, n=n: (0,) * n))

    # activations: TB batch elements per grid step
    inputs.append(x)
    in_specs.append(pl.BlockSpec((TB, S, Din), lambda b: (b, 0, 0)))

    add_full(padc(params["wp"], cols=Cp0))                          # (Din, Cp0)
    # proj bias folded into the pre-tiled positional encoding table (R, Cp0)
    add_full(jnp.tile(padc(params["pe"], cols=Cp0), (TB, 1))
             + padc(params["bp"], cols=Cp0))

    level_meta = []
    cin_pad = Cp0
    for i in range(num_levels):
        dil = 2 ** i
        kept = [k for k in range(K) if (K - 1 - k) * dil < S]       # drop dead taps
        shifts = [(K - 1 - k) * dil for k in kept]
        blk = params["blocks"][i]
        # pack kept taps into one (nk*Cin_pad, Ct) weight -> single fused matmul
        w1p = jnp.concatenate([padc(blk["w1"][k], rows=cin_pad, cols=Ct) for k in kept], axis=0)
        w2p = jnp.concatenate([padc(blk["w2"][k], rows=Ct, cols=Ct) for k in kept], axis=0)
        add_full(w1p)
        add_full(padc(blk["b1"], cols=Ct))
        add_full(w2p)
        add_full(padc(blk["b2"], cols=Ct))
        has_down = "wd" in blk
        if has_down:
            add_full(padc(blk["wd"], rows=cin_pad, cols=Ct))
            add_full(padc(blk["bd"], cols=Ct))
        level_meta.append({"shifts": shifts, "has_down": has_down})
        cin_pad = Ct

    add_full(padc(params["ln_g"], cols=Ct))
    add_full(padc(params["ln_b"], cols=Ct))

    kernel = make_kernel(S, TB, Ct, tcn_dim, level_meta)

    out = pl.pallas_call(
        kernel,
        out_shape=jax.ShapeDtypeStruct((B, S, Ct), jnp.float32),
        grid=(B // TB,),
        in_specs=in_specs,
        out_specs=pl.BlockSpec((TB, S, Ct), lambda b: (b, 0, 0)),
        compiler_params=pltpu.CompilerParams(
            dimension_semantics=("parallel",),
            vmem_limit_bytes=32 * 1024 * 1024),
    )(*inputs)
    return out[..., :tcn_dim]     # strip lane padding outside the kernel


# ----------------------------- params / reference ----------------------------


def make_positional_encoding(S, d_model):
    position = jnp.arange(S, dtype=jnp.float32)[:, None]
    div_term = jnp.exp(jnp.arange(0, d_model, 2, dtype=jnp.float32)
                       * (-math.log(10000.0) / d_model))
    pe = jnp.zeros((S, d_model), jnp.float32)
    pe = pe.at[:, 0::2].set(jnp.sin(position * div_term))
    pe = pe.at[:, 1::2].set(jnp.cos(position * div_term))
    return pe


def init_params(key, input_dim, proj_dim, tcn_dim, S, num_levels, kernel_size):
    keys = jax.random.split(key, 4 + 6 * num_levels)
    ki = iter(keys)
    p = {
        "wp": 0.1 * jax.random.normal(next(ki), (input_dim, proj_dim), jnp.float32),
        "bp": 0.1 * jax.random.normal(next(ki), (1, proj_dim), jnp.float32),
        "pe": make_positional_encoding(S, proj_dim),
        "ln_g": 1.0 + 0.05 * jax.random.normal(next(ki), (1, tcn_dim), jnp.float32),
        "ln_b": 0.05 * jax.random.normal(next(ki), (1, tcn_dim), jnp.float32),
        "blocks": [],
    }
    cin = proj_dim
    for _ in range(num_levels):
        blk = {
            "w1": 0.1 * jax.random.normal(next(ki), (kernel_size, cin, tcn_dim), jnp.float32),
            "b1": 0.1 * jax.random.normal(next(ki), (1, tcn_dim), jnp.float32),
            "w2": 0.1 * jax.random.normal(next(ki), (kernel_size, tcn_dim, tcn_dim), jnp.float32),
            "b2": 0.1 * jax.random.normal(next(ki), (1, tcn_dim), jnp.float32),
        }
        if cin != tcn_dim:
            blk["wd"] = 0.1 * jax.random.normal(next(ki), (cin, tcn_dim), jnp.float32)
            blk["bd"] = 0.1 * jax.random.normal(next(ki), (1, tcn_dim), jnp.float32)
        else:
            next(ki); next(ki)
        p["blocks"].append(blk)
        cin = tcn_dim
    return p


def ref_forward(x, params, *, num_levels, kernel_size, tcn_dim):
    B, S, _ = x.shape
    h = jnp.einsum("bsd,dp->bsp", x, params["wp"]) + params["bp"][None]
    h = h + params["pe"][None]
    for i, blk in enumerate(params["blocks"]):
        dil = 2 ** i

        def conv(a, w, b):
            out = jnp.zeros(a.shape[:2] + (tcn_dim,), jnp.float32) + b[None]
            for k in range(kernel_size):
                shift = (kernel_size - 1 - k) * dil
                a_s = jnp.pad(a, ((0, 0), (shift, 0), (0, 0)))[:, :S]
                out = out + jnp.einsum("bsc,cd->bsd", a_s, w[k])
            return out

        out1 = jnp.maximum(conv(h, blk["w1"], blk["b1"]), 0.0)
        out2 = jnp.maximum(conv(out1, blk["w2"], blk["b2"]), 0.0)
        if "wd" in blk:
            res = jnp.einsum("bsc,cd->bsd", h, blk["wd"]) + blk["bd"][None]
        else:
            res = h
        h = jnp.maximum(out2 + res, 0.0)
    mean = jnp.mean(h, axis=-1, keepdims=True)
    var = jnp.mean((h - mean) ** 2, axis=-1, keepdims=True)
    y = (h - mean) / jnp.sqrt(var + 1e-5)
    return y * params["ln_g"][None] + params["ln_b"][None]


# ----------------------------- main ------------------------------------------

if __name__ == "__main__":
    B, S = 2, 16
    input_dim, proj_dim, tcn_out_dim = 8, 8, 16
    num_levels, kernel_size = 2, 3

    key = jax.random.PRNGKey(0)
    kx, kp = jax.random.split(key)
    x = jax.random.normal(kx, (B, S, input_dim), jnp.float32)
    params = init_params(kp, input_dim, proj_dim, tcn_out_dim, S, num_levels, kernel_size)

    out = per_sensor_encoder_tcn(
        x, params, num_levels=num_levels, kernel_size=kernel_size,
        proj_dim=proj_dim, tcn_dim=tcn_out_dim)
    out = jax.block_until_ready(out)

    ref = ref_forward(x, params, num_levels=num_levels, kernel_size=kernel_size,
                      tcn_dim=tcn_out_dim)
    assert out.shape == (B, S, tcn_out_dim)
    assert jnp.allclose(out, ref, atol=1e-2, rtol=1e-2), float(jnp.max(jnp.abs(out - ref)))
    print("KERNEL_OK")
</pallas_src>

<mosaic_0001>
module attributes {stable_mosaic.version = 11 : i64} {
  func.func @kernel(%arg0: i32, %arg1: memref<2x16x8xf32, #tpu.memory_space<vmem>>, %arg2: memref<8x128xf32, #tpu.memory_space<vmem>>, %arg3: memref<32x128xf32, #tpu.memory_space<vmem>>, %arg4: memref<384x128xf32, #tpu.memory_space<vmem>>, %arg5: memref<1x128xf32, #tpu.memory_space<vmem>>, %arg6: memref<384x128xf32, #tpu.memory_space<vmem>>, %arg7: memref<1x128xf32, #tpu.memory_space<vmem>>, %arg8: memref<128x128xf32, #tpu.memory_space<vmem>>, %arg9: memref<1x128xf32, #tpu.memory_space<vmem>>, %arg10: memref<384x128xf32, #tpu.memory_space<vmem>>, %arg11: memref<1x128xf32, #tpu.memory_space<vmem>>, %arg12: memref<384x128xf32, #tpu.memory_space<vmem>>, %arg13: memref<1x128xf32, #tpu.memory_space<vmem>>, %arg14: memref<1x128xf32, #tpu.memory_space<vmem>>, %arg15: memref<1x128xf32, #tpu.memory_space<vmem>>, %arg16: memref<2x16x128xf32, #tpu.memory_space<vmem>>) attributes {dimension_semantics = [#tpu.dimension_semantics<parallel>], iteration_bounds = array<i64: 1>, scalar_prefetch = 0 : i64, scratch_operands = 0 : i64, tpu.core_type = #tpu.core_type<tc>, window_params = [{transform_indices = @transform_0, window_bounds = array<i64: 2, 16, 8>}, {pipeline_mode = #tpu.pipeline_mode<synchronous>, transform_indices = @transform_1, window_bounds = array<i64: 8, 128>}, {pipeline_mode = #tpu.pipeline_mode<synchronous>, transform_indices = @transform_2, window_bounds = array<i64: 32, 128>}, {pipeline_mode = #tpu.pipeline_mode<synchronous>, transform_indices = @transform_3, window_bounds = array<i64: 384, 128>}, {pipeline_mode = #tpu.pipeline_mode<synchronous>, transform_indices = @transform_4, window_bounds = array<i64: 1, 128>}, {pipeline_mode = #tpu.pipeline_mode<synchronous>, transform_indices = @transform_5, window_bounds = array<i64: 384, 128>}, {pipeline_mode = #tpu.pipeline_mode<synchronous>, transform_indices = @transform_6, window_bounds = array<i64: 1, 128>}, {pipeline_mode = #tpu.pipeline_mode<synchronous>, transform_indices = @transform_7, window_bounds = array<i64: 128, 128>}, {pipeline_mode = #tpu.pipeline_mode<synchronous>, transform_indices = @transform_8, window_bounds = array<i64: 1, 128>}, {pipeline_mode = #tpu.pipeline_mode<synchronous>, transform_indices = @transform_9, window_bounds = array<i64: 384, 128>}, {pipeline_mode = #tpu.pipeline_mode<synchronous>, transform_indices = @transform_10, window_bounds = array<i64: 1, 128>}, {pipeline_mode = #tpu.pipeline_mode<synchronous>, transform_indices = @transform_11, window_bounds = array<i64: 384, 128>}, {pipeline_mode = #tpu.pipeline_mode<synchronous>, transform_indices = @transform_12, window_bounds = array<i64: 1, 128>}, {pipeline_mode = #tpu.pipeline_mode<synchronous>, transform_indices = @transform_13, window_bounds = array<i64: 1, 128>}, {pipeline_mode = #tpu.pipeline_mode<synchronous>, transform_indices = @transform_14, window_bounds = array<i64: 1, 128>}, {transform_indices = @transform_15, window_bounds = array<i64: 2, 16, 128>}]} {
    %c0 = arith.constant 0 : index
    %c0_0 = arith.constant 0 : index
    %c0_1 = arith.constant 0 : index
    %0 = vector.load %arg1[%c0, %c0_0, %c0_1] : memref<2x16x8xf32, #tpu.memory_space<vmem>>, vector<2x16x8xf32>
    %1 = vector.shape_cast %0 : vector<2x16x8xf32> to vector<32x8xf32>
    %c0_2 = arith.constant 0 : index
    %c0_3 = arith.constant 0 : index
    %2 = vector.load %arg2[%c0_2, %c0_3] : memref<8x128xf32, #tpu.memory_space<vmem>>, vector<8x128xf32>
    %cst = arith.constant dense<0.000000e+00> : vector<32x128xf32>
    %3 = tpu.matmul %1, %2, %cst {dimension_numbers = #tpu.dot_dimension_numbers<[1], [0], [0], [1], [0, 0, 1, 1], [], []>} : vector<32x8xf32>, vector<8x128xf32>, vector<32x128xf32> -> vector<32x128xf32>
    %c0_4 = arith.constant 0 : index
    %c0_5 = arith.constant 0 : index
    %4 = vector.load %arg3[%c0_4, %c0_5] : memref<32x128xf32, #tpu.memory_space<vmem>>, vector<32x128xf32>
    %5 = arith.addf %3, %4 : vector<32x128xf32>
    %6 = tpu.iota {dimensions = array<i32: 0>} : vector<32x1xi32>
    %c16_i32 = arith.constant 16 : i32
    %c0_i32 = arith.constant 0 : i32
    %7 = arith.cmpi eq, %c16_i32, %c0_i32 : i32
    %c1_i32 = arith.constant 1 : i32
    %8 = arith.select %7, %c1_i32, %c16_i32 : i32
    %9 = vector.broadcast %8 : i32 to vector<32x1xi32>
    %10 = arith.remsi %6, %9 : vector<32x1xi32>
    %c0_i32_6 = arith.constant 0 : i32
    %11 = vector.broadcast %c0_i32_6 : i32 to vector<32x1xi32>
    %12 = arith.cmpi ne, %10, %11 : vector<32x1xi32>
    %c0_i32_7 = arith.constant 0 : i32
    %13 = vector.broadcast %c0_i32_7 : i32 to vector<32x1xi32>
    %14 = arith.cmpi slt, %10, %13 : vector<32x1xi32>
    %c0_i32_8 = arith.constant 0 : i32
    %15 = arith.cmpi slt, %8, %c0_i32_8 : i32
    %16 = vector.broadcast %15 : i1 to vector<32x1xi1>
    %17 = vector.broadcast %16 : vector<32x1xi1> to vector<32x1xi1>
    %18 = arith.xori %14, %17 : vector<32x1xi1>
    %19 = arith.andi %18, %12 : vector<32x1xi1>
    %20 = vector.broadcast %8 : i32 to vector<32x1xi32>
    %21 = arith.addi %10, %20 : vector<32x1xi32>
    %22 = arith.select %19, %21, %10 : vector<32x1xi1>, vector<32x1xi32>
    %c1_i32_9 = arith.constant 1 : i32
    %23 = vector.broadcast %c1_i32_9 : i32 to vector<32x1xi32>
    %24 = arith.cmpi sge, %22, %23 : vector<32x1xi32>
    %25 = arith.extui %24 : vector<32x1xi1> to vector<32x1xi32>
    %26 = arith.sitofp %25 : vector<32x1xi32> to vector<32x1xf32>
    %c2_i32 = arith.constant 2 : i32
    %27 = vector.broadcast %c2_i32 : i32 to vector<32x1xi32>
    %28 = arith.cmpi sge, %22, %27 : vector<32x1xi32>
    %29 = arith.extui %28 : vector<32x1xi1> to vector<32x1xi32>
    %30 = arith.sitofp %29 : vector<32x1xi32> to vector<32x1xf32>
    %c4_i32 = arith.constant 4 : i32
    %31 = vector.broadcast %c4_i32 : i32 to vector<32x1xi32>
    %32 = arith.cmpi sge, %22, %31 : vector<32x1xi32>
    %33 = arith.extui %32 : vector<32x1xi1> to vector<32x1xi32>
    %34 = arith.sitofp %33 : vector<32x1xi32> to vector<32x1xf32>
    %c2_i32_10 = arith.constant 2 : i32
    %35 = tpu.dynamic_rotate %5 by %c2_i32_10 dim 0 : vector<32x128xf32>, i32 -> vector<32x128xf32>
    %36 = vector.broadcast %30 : vector<32x1xf32> to vector<32x128xf32>
    %37 = arith.mulf %35, %36 : vector<32x128xf32>
    %c1_i32_11 = arith.constant 1 : i32
    %38 = tpu.dynamic_rotate %5 by %c1_i32_11 dim 0 : vector<32x128xf32>, i32 -> vector<32x128xf32>
    %39 = vector.broadcast %26 : vector<32x1xf32> to vector<32x128xf32>
    %40 = arith.mulf %38, %39 : vector<32x128xf32>
    %41 = tpu.concatenate %37, %40, %5 in 1 : vector<32x128xf32>, vector<32x128xf32>, vector<32x128xf32> -> vector<32x384xf32>
    %c0_12 = arith.constant 0 : index
    %c0_13 = arith.constant 0 : index
    %42 = vector.load %arg4[%c0_12, %c0_13] : memref<384x128xf32, #tpu.memory_space<vmem>>, vector<384x128xf32>
    %cst_14 = arith.constant dense<0.000000e+00> : vector<32x128xf32>
    %43 = tpu.matmul %41, %42, %cst_14 {dimension_numbers = #tpu.dot_dimension_numbers<[1], [0], [0], [1], [0, 0, 1, 1], [], []>} : vector<32x384xf32>, vector<384x128xf32>, vector<32x128xf32> -> vector<32x128xf32>
    %c0_15 = arith.constant 0 : index
    %c0_16 = arith.constant 0 : index
    %44 = vector.load %arg5[%c0_15, %c0_16] : memref<1x128xf32, #tpu.memory_space<vmem>>, vector<1x128xf32>
    %45 = vector.broadcast %44 : vector<1x128xf32> to vector<32x128xf32>
    %46 = arith.addf %43, %45 : vector<32x128xf32>
    %cst_17 = arith.constant 0.000000e+00 : f32
    %47 = vector.broadcast %cst_17 : f32 to vector<32x128xf32>
    %48 = arith.maximumf %46, %47 : vector<32x128xf32>
    %c2_i32_18 = arith.constant 2 : i32
    %49 = tpu.dynamic_rotate %48 by %c2_i32_18 dim 0 : vector<32x128xf32>, i32 -> vector<32x128xf32>
    %50 = vector.broadcast %30 : vector<32x1xf32> to vector<32x128xf32>
    %51 = arith.mulf %49, %50 : vector<32x128xf32>
    %c1_i32_19 = arith.constant 1 : i32
    %52 = tpu.dynamic_rotate %48 by %c1_i32_19 dim 0 : vector<32x128xf32>, i32 -> vector<32x128xf32>
    %53 = vector.broadcast %26 : vector<32x1xf32> to vector<32x128xf32>
    %54 = arith.mulf %52, %53 : vector<32x128xf32>
    %55 = tpu.concatenate %51, %54, %48 in 1 : vector<32x128xf32>, vector<32x128xf32>, vector<32x128xf32> -> vector<32x384xf32>
    %c0_20 = arith.constant 0 : index
    %c0_21 = arith.constant 0 : index
    %56 = vector.load %arg6[%c0_20, %c0_21] : memref<384x128xf32, #tpu.memory_space<vmem>>, vector<384x128xf32>
    %cst_22 = arith.constant dense<0.000000e+00> : vector<32x128xf32>
    %57 = tpu.matmul %55, %56, %cst_22 {dimension_numbers = #tpu.dot_dimension_numbers<[1], [0], [0], [1], [0, 0, 1, 1], [], []>} : vector<32x384xf32>, vector<384x128xf32>, vector<32x128xf32> -> vector<32x128xf32>
    %c0_23 = arith.constant 0 : index
    %c0_24 = arith.constant 0 : index
    %58 = vector.load %arg7[%c0_23, %c0_24] : memref<1x128xf32, #tpu.memory_space<vmem>>, vector<1x128xf32>
    %59 = vector.broadcast %58 : vector<1x128xf32> to vector<32x128xf32>
    %60 = arith.addf %57, %59 : vector<32x128xf32>
    %cst_25 = arith.constant 0.000000e+00 : f32
    %61 = vector.broadcast %cst_25 : f32 to vector<32x128xf32>
    %62 = arith.maximumf %60, %61 : vector<32x128xf32>
    %c0_26 = arith.constant 0 : index
    %c0_27 = arith.constant 0 : index
    %63 = vector.load %arg8[%c0_26, %c0_27] : memref<128x128xf32, #tpu.memory_space<vmem>>, vector<128x128xf32>
    %cst_28 = arith.constant dense<0.000000e+00> : vector<32x128xf32>
    %64 = tpu.matmul %5, %63, %cst_28 {dimension_numbers = #tpu.dot_dimension_numbers<[1], [0], [0], [1], [0, 0, 1, 1], [], []>} : vector<32x128xf32>, vector<128x128xf32>, vector<32x128xf32> -> vector<32x128xf32>
    %c0_29 = arith.constant 0 : index
    %c0_30 = arith.constant 0 : index
    %65 = vector.load %arg9[%c0_29, %c0_30] : memref<1x128xf32, #tpu.memory_space<vmem>>, vector<1x128xf32>
    %66 = vector.broadcast %65 : vector<1x128xf32> to vector<32x128xf32>
    %67 = arith.addf %64, %66 : vector<32x128xf32>
    %68 = arith.addf %62, %67 : vector<32x128xf32>
    %cst_31 = arith.constant 0.000000e+00 : f32
    %69 = vector.broadcast %cst_31 : f32 to vector<32x128xf32>
    %70 = arith.maximumf %68, %69 : vector<32x128xf32>
    %c4_i32_32 = arith.constant 4 : i32
    %71 = tpu.dynamic_rotate %70 by %c4_i32_32 dim 0 : vector<32x128xf32>, i32 -> vector<32x128xf32>
    %72 = vector.broadcast %34 : vector<32x1xf32> to vector<32x128xf32>
    %73 = arith.mulf %71, %72 : vector<32x128xf32>
    %c2_i32_33 = arith.constant 2 : i32
    %74 = tpu.dynamic_rotate %70 by %c2_i32_33 dim 0 : vector<32x128xf32>, i32 -> vector<32x128xf32>
    %75 = vector.broadcast %30 : vector<32x1xf32> to vector<32x128xf32>
    %76 = arith.mulf %74, %75 : vector<32x128xf32>
    %77 = tpu.concatenate %73, %76, %70 in 1 : vector<32x128xf32>, vector<32x128xf32>, vector<32x128xf32> -> vector<32x384xf32>
    %c0_34 = arith.constant 0 : index
    %c0_35 = arith.constant 0 : index
    %78 = vector.load %arg10[%c0_34, %c0_35] : memref<384x128xf32, #tpu.memory_space<vmem>>, vector<384x128xf32>
    %cst_36 = arith.constant dense<0.000000e+00> : vector<32x128xf32>
    %79 = tpu.matmul %77, %78, %cst_36 {dimension_numbers = #tpu.dot_dimension_numbers<[1], [0], [0], [1], [0, 0, 1, 1], [], []>} : vector<32x384xf32>, vector<384x128xf32>, vector<32x128xf32> -> vector<32x128xf32>
    %c0_37 = arith.constant 0 : index
    %c0_38 = arith.constant 0 : index
    %80 = vector.load %arg11[%c0_37, %c0_38] : memref<1x128xf32, #tpu.memory_space<vmem>>, vector<1x128xf32>
    %81 = vector.broadcast %80 : vector<1x128xf32> to vector<32x128xf32>
    %82 = arith.addf %79, %81 : vector<32x128xf32>
    %cst_39 = arith.constant 0.000000e+00 : f32
    %83 = vector.broadcast %cst_39 : f32 to vector<32x128xf32>
    %84 = arith.maximumf %82, %83 : vector<32x128xf32>
    %c4_i32_40 = arith.constant 4 : i32
    %85 = tpu.dynamic_rotate %84 by %c4_i32_40 dim 0 : vector<32x128xf32>, i32 -> vector<32x128xf32>
    %86 = vector.broadcast %34 : vector<32x1xf32> to vector<32x128xf32>
    %87 = arith.mulf %85, %86 : vector<32x128xf32>
    %c2_i32_41 = arith.constant 2 : i32
    %88 = tpu.dynamic_rotate %84 by %c2_i32_41 dim 0 : vector<32x128xf32>, i32 -> vector<32x128xf32>
    %89 = vector.broadcast %30 : vector<32x1xf32> to vector<32x128xf32>
    %90 = arith.mulf %88, %89 : vector<32x128xf32>
    %91 = tpu.concatenate %87, %90, %84 in 1 : vector<32x128xf32>, vector<32x128xf32>, vector<32x128xf32> -> vector<32x384xf32>
    %c0_42 = arith.constant 0 : index
    %c0_43 = arith.constant 0 : index
    %92 = vector.load %arg12[%c0_42, %c0_43] : memref<384x128xf32, #tpu.memory_space<vmem>>, vector<384x128xf32>
    %cst_44 = arith.constant dense<0.000000e+00> : vector<32x128xf32>
    %93 = tpu.matmul %91, %92, %cst_44 {dimension_numbers = #tpu.dot_dimension_numbers<[1], [0], [0], [1], [0, 0, 1, 1], [], []>} : vector<32x384xf32>, vector<384x128xf32>, vector<32x128xf32> -> vector<32x128xf32>
    %c0_45 = arith.constant 0 : index
    %c0_46 = arith.constant 0 : index
    %94 = vector.load %arg13[%c0_45, %c0_46] : memref<1x128xf32, #tpu.memory_space<vmem>>, vector<1x128xf32>
    %95 = vector.broadcast %94 : vector<1x128xf32> to vector<32x128xf32>
    %96 = arith.addf %93, %95 : vector<32x128xf32>
    %cst_47 = arith.constant 0.000000e+00 : f32
    %97 = vector.broadcast %cst_47 : f32 to vector<32x128xf32>
    %98 = arith.maximumf %96, %97 : vector<32x128xf32>
    %99 = arith.addf %98, %70 : vector<32x128xf32>
    %cst_48 = arith.constant 0.000000e+00 : f32
    %100 = vector.broadcast %cst_48 : f32 to vector<32x128xf32>
    %101 = arith.maximumf %99, %100 : vector<32x128xf32>
    %cst_49 = arith.constant dense<0.000000e+00> : vector<32xf32>
    %102 = vector.multi_reduction <add>, %101, %cst_49 [1] : vector<32x128xf32> to vector<32xf32>
    %103 = vector.shape_cast %102 : vector<32xf32> to vector<32x1xf32>
    %cst_50 = arith.constant 6.250000e-02 : f32
    %104 = vector.broadcast %cst_50 : f32 to vector<32x1xf32>
    %105 = arith.mulf %103, %104 : vector<32x1xf32>
    %106 = tpu.iota {dimensions = array<i32: 1>} : vector<1x128xi32>
    %c16_i32_51 = arith.constant 16 : i32
    %107 = vector.broadcast %c16_i32_51 : i32 to vector<1x128xi32>
    %108 = arith.cmpi slt, %106, %107 : vector<1x128xi32>
    %109 = arith.extui %108 : vector<1x128xi1> to vector<1x128xi32>
    %110 = arith.sitofp %109 : vector<1x128xi32> to vector<1x128xf32>
    %111 = vector.broadcast %105 : vector<32x1xf32> to vector<32x128xf32>
    %112 = arith.subf %101, %111 : vector<32x128xf32>
    %113 = vector.broadcast %110 : vector<1x128xf32> to vector<32x128xf32>
    %114 = arith.mulf %112, %113 : vector<32x128xf32>
    %115 = arith.mulf %114, %114 : vector<32x128xf32>
    %cst_52 = arith.constant dense<0.000000e+00> : vector<32xf32>
    %116 = vector.multi_reduction <add>, %115, %cst_52 [1] : vector<32x128xf32> to vector<32xf32>
    %117 = vector.shape_cast %116 : vector<32xf32> to vector<32x1xf32>
    %cst_53 = arith.constant 6.250000e-02 : f32
    %118 = vector.broadcast %cst_53 : f32 to vector<32x1xf32>
    %119 = arith.mulf %117, %118 : vector<32x1xf32>
    %cst_54 = arith.constant 9.99999974E-6 : f32
    %120 = vector.broadcast %cst_54 : f32 to vector<32x1xf32>
    %121 = arith.addf %119, %120 : vector<32x1xf32>
    %122 = math.rsqrt %121 : vector<32x1xf32>
    %123 = vector.broadcast %122 : vector<32x1xf32> to vector<32x128xf32>
    %124 = arith.mulf %114, %123 : vector<32x128xf32>
    %c0_55 = arith.constant 0 : index
    %c0_56 = arith.constant 0 : index
    %125 = vector.load %arg14[%c0_55, %c0_56] : memref<1x128xf32, #tpu.memory_space<vmem>>, vector<1x128xf32>
    %126 = vector.broadcast %125 : vector<1x128xf32> to vector<32x128xf32>
    %127 = arith.mulf %124, %126 : vector<32x128xf32>
    %c0_57 = arith.constant 0 : index
    %c0_58 = arith.constant 0 : index
    %128 = vector.load %arg15[%c0_57, %c0_58] : memref<1x128xf32, #tpu.memory_space<vmem>>, vector<1x128xf32>
    %129 = vector.broadcast %128 : vector<1x128xf32> to vector<32x128xf32>
    %130 = arith.addf %127, %129 : vector<32x128xf32>
    %131 = vector.shape_cast %130 : vector<32x128xf32> to vector<2x16x128xf32>
    %c0_59 = arith.constant 0 : index
    %c0_60 = arith.constant 0 : index
    %c0_61 = arith.constant 0 : index
    %132 = vector.load %arg16[%c0_59, %c0_60, %c0_61] : memref<2x16x128xf32, #tpu.memory_space<vmem>>, vector<2x16x128xf32>
    tpu.vector_store %arg16[%c0_59, %c0_60, %c0_61], %131 {strides = array<i32>} : memref<2x16x128xf32, #tpu.memory_space<vmem>>, vector<2x16x128xf32>,
    return
  }
  func.func @transform_0(%arg0: i32) -> (i32, i32, i32) {
    %c0_i32 = arith.constant 0 : i32
    %c0_i32_0 = arith.constant 0 : i32
    %c0_i32_1 = arith.constant 0 : i32
    return %arg0, %c0_i32, %c0_i32_0 : i32, i32, i32
  }
  func.func @transform_1(%arg0: i32) -> (i32, i32) {
    %c0_i32 = arith.constant 0 : i32
    %c0_i32_0 = arith.constant 0 : i32
    %c0_i32_1 = arith.constant 0 : i32
    return %c0_i32, %c0_i32_0 : i32, i32
  }
  func.func @transform_2(%arg0: i32) -> (i32, i32) {
    %c0_i32 = arith.constant 0 : i32
    %c0_i32_0 = arith.constant 0 : i32
    %c0_i32_1 = arith.constant 0 : i32
    return %c0_i32, %c0_i32_0 : i32, i32
  }
  func.func @transform_3(%arg0: i32) -> (i32, i32) {
    %c0_i32 = arith.constant 0 : i32
    %c0_i32_0 = arith.constant 0 : i32
    %c0_i32_1 = arith.constant 0 : i32
    return %c0_i32, %c0_i32_0 : i32, i32
  }
  func.func @transform_4(%arg0: i32) -> (i32, i32) {
    %c0_i32 = arith.constant 0 : i32
    %c0_i32_0 = arith.constant 0 : i32
    %c0_i32_1 = arith.constant 0 : i32
    return %c0_i32, %c0_i32_0 : i32, i32
  }
  func.func @transform_5(%arg0: i32) -> (i32, i32) {
    %c0_i32 = arith.constant 0 : i32
    %c0_i32_0 = arith.constant 0 : i32
    %c0_i32_1 = arith.constant 0 : i32
    return %c0_i32, %c0_i32_0 : i32, i32
  }
  func.func @transform_6(%arg0: i32) -> (i32, i32) {
    %c0_i32 = arith.constant 0 : i32
    %c0_i32_0 = arith.constant 0 : i32
    %c0_i32_1 = arith.constant 0 : i32
    return %c0_i32, %c0_i32_0 : i32, i32
  }
  func.func @transform_7(%arg0: i32) -> (i32, i32) {
    %c0_i32 = arith.constant 0 : i32
    %c0_i32_0 = arith.constant 0 : i32
    %c0_i32_1 = arith.constant 0 : i32
    return %c0_i32, %c0_i32_0 : i32, i32
  }
  func.func @transform_8(%arg0: i32) -> (i32, i32) {
    %c0_i32 = arith.constant 0 : i32
    %c0_i32_0 = arith.constant 0 : i32
    %c0_i32_1 = arith.constant 0 : i32
    return %c0_i32, %c0_i32_0 : i32, i32
  }
  func.func @transform_9(%arg0: i32) -> (i32, i32) {
    %c0_i32 = arith.constant 0 : i32
    %c0_i32_0 = arith.constant 0 : i32
    %c0_i32_1 = arith.constant 0 : i32
    return %c0_i32, %c0_i32_0 : i32, i32
  }
  func.func @transform_10(%arg0: i32) -> (i32, i32) {
    %c0_i32 = arith.constant 0 : i32
    %c0_i32_0 = arith.constant 0 : i32
    %c0_i32_1 = arith.constant 0 : i32
    return %c0_i32, %c0_i32_0 : i32, i32
  }
  func.func @transform_11(%arg0: i32) -> (i32, i32) {
    %c0_i32 = arith.constant 0 : i32
    %c0_i32_0 = arith.constant 0 : i32
    %c0_i32_1 = arith.constant 0 : i32
    return %c0_i32, %c0_i32_0 : i32, i32
  }
  func.func @transform_12(%arg0: i32) -> (i32, i32) {
    %c0_i32 = arith.constant 0 : i32
    %c0_i32_0 = arith.constant 0 : i32
    %c0_i32_1 = arith.constant 0 : i32
    return %c0_i32, %c0_i32_0 : i32, i32
  }
  func.func @transform_13(%arg0: i32) -> (i32, i32) {
    %c0_i32 = arith.constant 0 : i32
    %c0_i32_0 = arith.constant 0 : i32
    %c0_i32_1 = arith.constant 0 : i32
    return %c0_i32, %c0_i32_0 : i32, i32
  }
  func.func @transform_14(%arg0: i32) -> (i32, i32) {
    %c0_i32 = arith.constant 0 : i32
    %c0_i32_0 = arith.constant 0 : i32
    %c0_i32_1 = arith.constant 0 : i32
    return %c0_i32, %c0_i32_0 : i32, i32
  }
  func.func @transform_15(%arg0: i32) -> (i32, i32, i32) {
    %c0_i32 = arith.constant 0 : i32
    %c0_i32_0 = arith.constant 0 : i32
    %c0_i32_1 = arith.constant 0 : i32
    return %arg0, %c0_i32, %c0_i32_0 : i32, i32, i32
  }
}

</mosaic_0001>

<bundles_post_ra>
// kernel: tpu_custom_call.1
= control target key start
LH: loop header
LB: loop body
LE: loop exit
PB: predicated region body
PF: predicated region fallthrough
CT: control target
= control target key end

     0   :  { %20 = vsyncpa [#allocation3], 0  ;;  %s1805_s0 = inlined_call_operand.vmem [shape: f32[2,16,8], index: 0, kind: input, shape index: {}]   ;;  %s1806_s1 = inlined_call_operand.vmem [shape: f32[8,128], index: 1, kind: input, shape index: {}]   ;;  %s1807_s2 = inlined_call_operand.vmem [shape: f32[32,128], index: 2, kind: input, shape index: {}]   ;;  %s1808_s3 = inlined_call_operand.hbm [shape: f32[384,128], index: 3, kind: input, shape index: {}]   ;;  %s1809_s4 = inlined_call_operand.vmem [shape: f32[1,128], index: 4, kind: input, shape index: {}]   ;;  %s1810_s5 = inlined_call_operand.hbm [shape: f32[384,128], index: 5, kind: input, shape index: {}]   ;;  %s1811_s6 = inlined_call_operand.vmem [shape: f32[1,128], index: 6, kind: input, shape index: {}]   ;;  %s1812_s7 = inlined_call_operand.hbm [shape: f32[128,128], index: 7, kind: input, shape index: {}]   ;;  %s1813_s8 = inlined_call_operand.vmem [shape: f32[1,128], index: 8, kind: input, shape index: {}]   ;;  %s1814_s9 = inlined_call_operand.hbm [shape: f32[384,128], index: 9, kind: input, shape index: {}]   ;;  %s1815_s10 = inlined_call_operand.vmem [shape: f32[1,128], index: 10, kind: input, shape index: {}]   ;;  %s1816_s11 = inlined_call_operand.hbm [shape: f32[384,128], index: 11, kind: input, shape index: {}]   ;;  %s1817_s12 = inlined_call_operand.vmem [shape: f32[1,128], index: 12, kind: input, shape index: {}]   ;;  %s1818_s13 = inlined_call_operand.vmem [shape: f32[1,128], index: 13, kind: input, shape index: {}]   ;;  %s1819_s14 = inlined_call_operand.vmem [shape: f32[1,128], index: 14, kind: input, shape index: {}]   ;;  %s1820_s15 = inlined_call_operand.hbm [shape: f32[2,16,128], index: 15, kind: output, shape index: {}]  }
   0x1   :  { %21 = vsyncpa [#allocation6], 0 }
   0x2   :  { %22 = vsyncpa [#allocation9], 0 }
   0x3   :  { %23 = vsyncpa [#allocation4], 0  ;;  %s49_s20 = sshll.u32 %s1810_s5, 4  ;;  %s1370_s21 = smov [#allocation5]   ;;  %s50_s20 = int_to_ptr.hbm [resolvable:$true] %s49_s20 }
   0x4   :  { %s51_s22 = sshll.u32 %s1370_s21, 4  ;;  %s79_s25 = sshll.u32 %s1814_s9, 4  ;;  %s52_s22 = int_to_ptr.vmem [resolvable:$true] %s51_s22  ;;  %s80_s25 = int_to_ptr.hbm [resolvable:$true] %s79_s25 }
   0x5   :  { %s1371_s26 = smov 128   ;;  %s1372_s27 = smov 8  }
   0x6   :  { %57 = dma.hbm_to_vmem [thread:$0]  %s50_s20, 6144, %s52_s22, [#allocation6], %s1371_s26, %s1371_s26, %s1372_s27  }
   0x7   :  { %s1373_s28 = smov [#allocation8]   ;;  %s34_s5 = sshll.u32 %s1808_s3, 4  ;;  %s35_s5 = int_to_ptr.hbm [resolvable:$true] %s34_s5 }
   0x8   :  { %s81_s29 = sshll.u32 %s1373_s28, 4  ;;  %s64_s18 = sshll.u32 %s1812_s7, 4  ;;  %s82_s29 = int_to_ptr.vmem [resolvable:$true] %s81_s29  ;;  %s65_s18 = int_to_ptr.hbm [resolvable:$true] %s64_s18 }
   0x9   :  { %87 = dma.hbm_to_vmem [thread:$0]  %s80_s25, 6144, %s82_s29, [#allocation9], %s1371_s26, %s1371_s26, %s1372_s27  }
   0xa   :  { %s1374_s19 = smov [#allocation2]   ;;  %s1375_s20 = smov [#allocation7]  }
   0xb   :  { %s36_s21 = sshll.u32 %s1374_s19, 4  ;;  %s66_s3 = sshll.u32 %s1375_s20, 4  ;;  %s37_s21 = int_to_ptr.vmem [resolvable:$true] %s36_s21  ;;  %s67_s3 = int_to_ptr.vmem [resolvable:$true] %s66_s3 }
   0xc   :  { %42 = dma.hbm_to_vmem [thread:$0]  %s35_s5, 6144, %s37_s21, [#allocation3], %s1371_s26, %s1371_s26, %s1372_s27  }
   0xd   :  { %s94_s24 = sshll.u32 %s1816_s11, 4  ;;  %s1376_s7 = smov [#allocation10]   ;;  %s95_s24 = int_to_ptr.hbm [resolvable:$true] %s94_s24 }
   0xe   :  { %72 = dma.hbm_to_vmem [thread:$0]  %s65_s18, 2048, %s67_s3, [#allocation6], %s1371_s26, %s1371_s26, %s1372_s27  }
   0xf   :  { %s96_s25 = sshll.u32 %s1376_s7, 4  ;;  %s97_s25 = int_to_ptr.vmem [resolvable:$true] %s96_s25 }
  0x10   :  { %102 = dma.hbm_to_vmem [thread:$0]  %s95_s24, 6144, %s97_s25, [#allocation9], %s1371_s26, %s1371_s26, %s1372_s27  }
  0x11   :  { %1362 = dma.done.wait [#allocation3], 6144  }
  0x12   :  { %1363 = vsyncadd [#allocation3], 4294961152 }
  0x13   :  { %1364 = dma.done.wait [#allocation6], 8192  }
  0x14   :  { %1365 = vsyncadd [#allocation6], 4294959104 }
  0x15   :  { %1366 = dma.done.wait [#allocation9], 12288  }
  0x16   :  { %1367 = vsyncadd [#allocation9], 4294955008  ;;  %vm138_vm0 = vcmask 64512   ;;  %v133_v0 = vld [vmem:[%s1806_s1] sm:$0xff]  ;;  %v342_v2 = vld [vmem:[#allocation2 + $0x178] sm:$0xff]  ;;  %s1120_s17 = sshll.u32 %s1820_s15, 4  ;;  %s1121_s17 = int_to_ptr.hbm [resolvable:$true] %s1120_s17 }
  0x17   :  { %v129_v1 = vld [vmem:[%s1805_s0] sm:$0xff]  ;;  %166 = vmatpush.msra.mxu0 %v133_v0  ;;  %405 = vmatpush.msra.mxu3 %v342_v2  ;;  %v341_v3 = vld [vmem:[#allocation2 + $0x170] sm:$0xff]  ;;  %v340_v4 = vld [vmem:[#allocation2 + $0x168] sm:$0xff] }
  0x18   :  { %1135 = vmatmul.msk.f32.vlgmr.msra.gmra.mxu0 %vm138_vm0, %v129_v1  ;;  %v339_v5 = vld [vmem:[#allocation2 + $0x160] sm:$0xff]  ;;  %v130_v6 = vld [vmem:[%s1805_s0 + $0x8] sm:$0xff]  ;;  %v338_v7 = vld [vmem:[#allocation2 + $0x158] sm:$0xff] }
  0x19   :  { %406 = vmatpush.msra.mxu3 %v341_v3  ;;  %v337_v8 = vld [vmem:[#allocation2 + $0x150] sm:$0xff]  ;;  %v336_v9 = vld [vmem:[#allocation2 + $0x148] sm:$0xff]  ;;  %v335_v10 = vld [vmem:[#allocation2 + $0x140] sm:$0xff] }
  0x1a   :  { %v131_v11 = vld [vmem:[%s1805_s0 + $0x10] sm:$0xff]  ;;  %v334_v12 = vld [vmem:[#allocation2 + $0x138] sm:$0xff]  ;;  %v332_v14 = vld [vmem:[#allocation2 + $0x128] sm:$0xff] }
  0x1b   :  { %407 = vmatpush.msra.mxu3 %v340_v4  ;;  %v333_v13 = vld [vmem:[#allocation2 + $0x130] sm:$0xff]  ;;  %v331_v15 = vld [vmem:[#allocation2 + $0x120] sm:$0xff]  ;;  %v132_v16 = vld [vmem:[%s1805_s0 + $0x18] sm:$0xff] }
  0x1c   :  { %v330_v17 = vld [vmem:[#allocation2 + $0x118] sm:$0xff]  ;;  %v329_v18 = vld [vmem:[#allocation2 + $0x110] sm:$0xff]  ;;  %v328_v19 = vld [vmem:[#allocation2 + $0x108] sm:$0xff] }
  0x1d   :  { %408 = vmatpush.msra.mxu3 %v339_v5  ;;  %v310_v20 = vld [vmem:[#allocation2 + $0x78] sm:$0xff]  ;;  %v327_v22 = vld [vmem:[#allocation2 + $0x100] sm:$0xff]  ;;  %v309_v23 = vld [vmem:[#allocation2 + $0x70] sm:$0xff] }
  0x1e   :  { %v326_v21 = vld [vmem:[#allocation2 + $0xf8] sm:$0xff]  ;;  %347 = vmatpush.msra.mxu1 %v310_v20  ;;  %v325_v24 = vld [vmem:[#allocation2 + $0xf0] sm:$0xff]  ;;  %v308_v26 = vld [vmem:[#allocation2 + $0x68] sm:$0xff]  ;;  %v1377_v20 = vmov 0.0  }
  0x1f   :  { %409 = vmatpush.msra.mxu3 %v338_v7  ;;  %376 = vmatpush.msra.mxu2 %v326_v21  ;;  %v620_v25 = vld [vmem:[#allocation7 + $0x78] sm:$0xff]  ;;  %v324_v27 = vld [vmem:[#allocation2 + $0xe8] sm:$0xff]  ;;  %v619_v28 = vld [vmem:[#allocation7 + $0x70] sm:$0xff] }
  0x20   :  { %1136 = vmatmul.msk.f32.gmra.mxu0 %vm138_vm0, %v130_v6  ;;  %348 = vmatpush.msra.mxu1 %v309_v23  ;;  %v307_v29 = vld [vmem:[#allocation2 + $0x60] sm:$0xff]  ;;  %v618_v31 = vld [vmem:[#allocation7 + $0x68] sm:$0xff]  ;;  %v306_v32 = vld [vmem:[#allocation2 + $0x58] sm:$0xff] }
  0x21   :  { %410 = vmatpush.msra.mxu3 %v337_v8  ;;  %377 = vmatpush.msra.mxu2 %v325_v24  ;;  %v323_v30 = vld [vmem:[#allocation2 + $0xe0] sm:$0xff]  ;;  %v322_v33 = vld [vmem:[#allocation2 + $0xd8] sm:$0xff]  ;;  %v305_v35 = vld [vmem:[#allocation2 + $0x50] sm:$0xff] }
  0x22   :  { %349 = vmatpush.msra.mxu1 %v308_v26  ;;  %v617_v34 = vld [vmem:[#allocation7 + $0x60] sm:$0xff]  ;;  %v321_v36 = vld [vmem:[#allocation2 + $0xd0] sm:$0xff]  ;;  %v616_v37 = vld [vmem:[#allocation7 + $0x58] sm:$0xff] }
  0x23   :  { %411 = vmatpush.msra.mxu3 %v336_v9  ;;  %378 = vmatpush.msra.mxu2 %v324_v27  ;;  %v304_v38 = vld [vmem:[#allocation2 + $0x48] sm:$0xff]  ;;  %v615_v40 = vld [vmem:[#allocation7 + $0x50] sm:$0xff]  ;;  %v303_v41 = vld [vmem:[#allocation2 + $0x40] sm:$0xff] }
  0x24   :  { %350 = vmatpush.msra.mxu1 %v307_v29  ;;  %v320_v39 = vld [vmem:[#allocation2 + $0xc8] sm:$0xff]  ;;  %v319_v42 = vld [vmem:[#allocation2 + $0xc0] sm:$0xff]  ;;  %v302_v44 = vld [vmem:[#allocation2 + $0x38] sm:$0xff] }
  0x25   :  { %412 = vmatpush.msra.mxu3 %v335_v10  ;;  %379 = vmatpush.msra.mxu2 %v323_v30  ;;  %v614_v43 = vld [vmem:[#allocation7 + $0x48] sm:$0xff]  ;;  %v318_v45 = vld [vmem:[#allocation2 + $0xb8] sm:$0xff]  ;;  %v613_v46 = vld [vmem:[#allocation7 + $0x40] sm:$0xff] }
  0x26   :  { %351 = vmatpush.msra.mxu1 %v306_v32  ;;  %v301_v47 = vld [vmem:[#allocation2 + $0x30] sm:$0xff]  ;;  %v612_v49 = vld [vmem:[#allocation7 + $0x38] sm:$0xff]  ;;  %v300_v50 = vld [vmem:[#allocation2 + $0x28] sm:$0xff] }
  0x27   :  { %413 = vmatpush.msra.mxu3 %v334_v12  ;;  %380 = vmatpush.msra.mxu2 %v322_v33  ;;  %v317_v48 = vld [vmem:[#allocation2 + $0xb0] sm:$0xff]  ;;  %v316_v51 = vld [vmem:[#allocation2 + $0xa8] sm:$0xff]  ;;  %v299_v53 = vld [vmem:[#allocation2 + $0x20] sm:$0xff] }
  0x28   :  { %1137 = vmatmul.msk.f32.gmra.mxu0 %vm138_vm0, %v131_v11  ;;  %352 = vmatpush.msra.mxu1 %v305_v35  ;;  %v611_v52 = vld [vmem:[#allocation7 + $0x30] sm:$0xff]  ;;  %v315_v54 = vld [vmem:[#allocation2 + $0xa0] sm:$0xff]  ;;  %v610_v55 = vld [vmem:[#allocation7 + $0x28] sm:$0xff]  ;;  %v180_v11 = vlaneseq }
  0x29   :  { %414 = vmatpush.msra.mxu3 %v333_v13  ;;  %381 = vmatpush.msra.mxu2 %v321_v36  ;;  %v298_v56 = vld [vmem:[#allocation2 + $0x18] sm:$0xff]  ;;  %v609_v58 = vld [vmem:[#allocation7 + $0x20] sm:$0xff]  ;;  %v297_v59 = vld [vmem:[#allocation2 + $0x10] sm:$0xff] }
  0x2a   :  { %353 = vmatpush.msra.mxu1 %v304_v38  ;;  %v314_v57 = vld [vmem:[#allocation2 + $0x98] sm:$0xff]  ;;  %v313_v60 = vld [vmem:[#allocation2 + $0x90] sm:$0xff]  ;;  %v296_v62 = vld [vmem:[#allocation2 + $0x8] sm:$0xff] }
  0x2b   :  { %415 = vmatpush.msra.mxu3 %v332_v14  ;;  %382 = vmatpush.msra.mxu2 %v320_v39  ;;  %v608_v61 = vld [vmem:[#allocation7 + $0x18] sm:$0xff]  ;;  %v312_v63 = vld [vmem:[#allocation2 + $0x88] sm:$0xff]  ;;  %v607_v0 = vld [vmem:[#allocation7 + $0x10] sm:$0xff] }
  0x2c   :  { %354 = vmatpush.msra.mxu1 %v303_v41  ;;  %v295_v1 = vld [vmem:[#allocation2] sm:$0xff]  ;;  %v606_v4 = vld [vmem:[#allocation7 + $0x8] sm:$0xff]  ;;  %v136_v12 = vld [vmem:[%s1807_s2 + $0x10] sm:$0xff] }
  0x2d   :  { %416 = vmatpush.msra.mxu3 %v331_v15  ;;  %383 = vmatpush.msra.mxu2 %v319_v42  ;;  %v311_v2 = vld [vmem:[#allocation2 + $0x80] sm:$0xff]  ;;  %v135_v8 = vld [vmem:[%s1807_s2 + $0x8] sm:$0xff]  ;;  %v1518_v15 = vshrl.u32 %v180_v11, 7 }
  0x2e   :  { %355 = vmatpush.msra.mxu1 %v302_v44  ;;  %v134_v3 = vld [vmem:[%s1807_s2] sm:$0xff] }
  0x2f   :  { %417 = vmatpush.msra.mxu3 %v330_v17  ;;  %384 = vmatpush.msra.mxu2 %v318_v45  ;;  %v605_v6 = vld [vmem:[#allocation7] sm:$0xff]  ;;  %v137_v17 = vld [vmem:[%s1807_s2 + $0x18] sm:$0xff]  ;;  %vm273_vm3 = vcmp.lt.s32.totalorder %v1518_v15, 2  ;;  %vm286_vm4 = vcmp.lt.s32.totalorder %v1518_v15, 1  ;;  %vm666_vm8 = vcmp.lt.s32.totalorder %v1518_v15, 4 }
  0x30   :  { %1138 = vmatmul.msk.f32.gmra.mxu0 %vm138_vm0, %v132_v16  ;;  %356 = vmatpush.msra.mxu1 %v301_v47  ;;  %v1521_v16 = vand.u32 15, %v1518_v15  ;;  %v509_v47 = vld [vmem:[#allocation5 + $0x178] sm:$0xff] }
  0x31   :  { %418 = vmatpush.msra.mxu3 %v329_v18  ;;  %385 = vmatpush.msra.mxu2 %v317_v48  ;;  %v508_v48 = vld [vmem:[#allocation5 + $0x170] sm:$0xff] }
  0x32   :  { %357 = vmatpush.msra.mxu1 %v300_v50  ;;  %vm245_vm1 = vcmp.ge.s32.totalorder %v1521_v16, 2  ;;  %vm233_vm2 = vcmp.ge.s32.totalorder %v1521_v16, 1  ;;  %v506_v50 = vld [vmem:[#allocation5 + $0x160] sm:$0xff]  ;;  %vm257_vm7 = vcmp.ge.s32.totalorder %v1521_v16, 4 }
  0x33   :  { %419 = vmatpush.msra.mxu3 %v328_v19  ;;  %386 = vmatpush.msra.mxu2 %v316_v51  ;;  %v1529_v21 = vsel %vm245_vm1, 1.0, %v1377_v20  ;;  %v505_v51 = vld [vmem:[#allocation5 + $0x158] sm:$0xff] }
  0x34   :  { %358 = vmatpush.msra.mxu1 %v299_v53  ;;  %v503_v53 = vld [vmem:[#allocation5 + $0x148] sm:$0xff] }
  0x35   :  { %420 = vmatpush.msra.mxu3 %v327_v22  ;;  %387 = vmatpush.msra.mxu2 %v315_v54  ;;  %v1532_v22 = vsel %vm233_vm2, 1.0, %v1377_v20  ;;  %v502_v54 = vld [vmem:[#allocation5 + $0x140] sm:$0xff] }
  0x36   :  { %359 = vmatpush.msra.mxu1 %v298_v56  ;;  %v500_v56 = vld [vmem:[#allocation5 + $0x130] sm:$0xff] }
  0x37   :  { %625 = vmatpush.msrb.mxu3 %v620_v25  ;;  %388 = vmatpush.msra.mxu2 %v314_v57  ;;  %v499_v57 = vld [vmem:[#allocation5 + $0x128] sm:$0xff] }
  0x38   :  { %360 = vmatpush.msra.mxu1 %v297_v59  ;;  %v497_v59 = vld [vmem:[#allocation5 + $0x118] sm:$0xff] }
  0x39   :  { %626 = vmatpush.msrb.mxu3 %v619_v28  ;;  %389 = vmatpush.msra.mxu2 %v313_v60  ;;  %v496_v60 = vld [vmem:[#allocation5 + $0x110] sm:$0xff] }
  0x3a   :  { %361 = vmatpush.msra.mxu1 %v296_v62  ;;  %v477_v62 = vld [vmem:[#allocation5 + $0x78] sm:$0xff] }
  0x3b   :  { %627 = vmatpush.msrb.mxu3 %v618_v31  ;;  %390 = vmatpush.msra.mxu2 %v312_v63  ;;  %v183_v31 = vadd.s32 16, %v1518_v15  ;;  %v493_v63 = vld [vmem:[#allocation5 + $0xf8] sm:$0xff] }
  0x3c   :  { %362 = vmatpush.msra.mxu1 %v295_v1  ;;  %514 = vmatpush.msrb.mxu0 %v477_v62  ;;  %v476_v1 = vld [vmem:[#allocation5 + $0x70] sm:$0xff] }
  0x3d   :  { %628 = vmatpush.msrb.mxu3 %v617_v34  ;;  %391 = vmatpush.msra.mxu2 %v311_v2  ;;  %v1543_v34 = vand.u32 15, %v183_v31  ;;  %v492_v2 = vld [vmem:[#allocation5 + $0xf0] sm:$0xff] }
  0x3e   :  { %543 = vmatpush.msrb.mxu1 %v493_v63  ;;  %515 = vmatpush.msrb.mxu0 %v476_v1 }
  0x3f   :  { %629 = vmatpush.msrb.mxu3 %v616_v37  ;;  %vm247_vm5 = vcmp.ge.s32.totalorder %v1543_v34, 2  ;;  %vm235_vm6 = vcmp.ge.s32.totalorder %v1543_v34, 1  ;;  %572 = vmatpush.msrb.mxu2 %v509_v47  ;;  %vm259_vm9 = vcmp.ge.s32.totalorder %v1543_v34, 4 }
  0x40   :  { %v1552_v39 = vsel %vm247_vm5, 1.0, %v1377_v20  ;;  %v1557_v41 = vsel %vm235_vm6, 1.0, %v1377_v20  ;;  %544 = vmatpush.msrb.mxu1 %v492_v2 }
  0x41   :  { %630 = vmatpush.msrb.mxu3 %v615_v40  ;;  %573 = vmatpush.msrb.mxu2 %v508_v48 }
  0x43   :  { %631 = vmatpush.msrb.mxu3 %v614_v43 }
  0x45   :  { %632 = vmatpush.msrb.mxu3 %v613_v46 }
  0x47   :  { %633 = vmatpush.msrb.mxu3 %v612_v49  ;;  %v507_v49 = vld [vmem:[#allocation5 + $0x168] sm:$0xff] }
  0x48   :  { %574 = vmatpush.msrb.mxu2 %v507_v49 }
  0x49   :  { %634 = vmatpush.msrb.mxu3 %v611_v52  ;;  %v504_v52 = vld [vmem:[#allocation5 + $0x150] sm:$0xff] }
  0x4a   :  { %575 = vmatpush.msrb.mxu2 %v506_v50 }
  0x4b   :  { %635 = vmatpush.msrb.mxu3 %v610_v55  ;;  %v501_v55 = vld [vmem:[#allocation5 + $0x138] sm:$0xff] }
  0x4c   :  { %576 = vmatpush.msrb.mxu2 %v505_v51 }
  0x4d   :  { %636 = vmatpush.msrb.mxu3 %v609_v58  ;;  %v498_v58 = vld [vmem:[#allocation5 + $0x120] sm:$0xff] }
  0x4e   :  { %577 = vmatpush.msrb.mxu2 %v504_v52 }
  0x4f   :  { %637 = vmatpush.msrb.mxu3 %v608_v61  ;;  %v495_v61 = vld [vmem:[#allocation5 + $0x108] sm:$0xff] }
  0x50   :  { %578 = vmatpush.msrb.mxu2 %v503_v53 }
  0x51   :  { %638 = vmatpush.msrb.mxu3 %v607_v0  ;;  %v494_v0 = vld [vmem:[#allocation5 + $0x100] sm:$0xff] }
  0x52   :  { %579 = vmatpush.msrb.mxu2 %v502_v54 }
  0x53   :  { %639 = vmatpush.msrb.mxu3 %v606_v4  ;;  %v491_v4 = vld [vmem:[#allocation5 + $0xe8] sm:$0xff] }
  0x54   :  { %580 = vmatpush.msrb.mxu2 %v501_v55  ;;  %545 = vmatpush.msrb.mxu1 %v491_v4 }
  0x55   :  { %640 = vmatpush.msrb.mxu3 %v605_v6  ;;  %v490_v6 = vld [vmem:[#allocation5 + $0xe0] sm:$0xff] }
  0x56   :  { %581 = vmatpush.msrb.mxu2 %v500_v56  ;;  %546 = vmatpush.msrb.mxu1 %v490_v6 }
  0x58   :  { %582 = vmatpush.msrb.mxu2 %v499_v57 }
  0x5a   :  { %583 = vmatpush.msrb.mxu2 %v498_v58 }
  0x5c   :  { %584 = vmatpush.msrb.mxu2 %v497_v59 }
  0x5e   :  { %585 = vmatpush.msrb.mxu2 %v496_v60 }
  0x60   :  { %586 = vmatpush.msrb.mxu2 %v495_v61 }
  0x62   :  { %587 = vmatpush.msrb.mxu2 %v494_v0 }
  0x95   :  { %v168_v5 = vpop.f32.mrf.mxu0 }
  0x96   :  { %v169_v7 = vadd.f32 %v168_v5, %v134_v3  ;;  %v475_v3 = vld [vmem:[#allocation5 + $0x68] sm:$0xff]  ;;  %v474_v5 = vld [vmem:[#allocation5 + $0x60] sm:$0xff] }
  0x97   :  { %516 = vmatpush.msrb.mxu0 %v475_v3 }
  0x98   :  { %421 = vmatmul.f32.vlgmr.msra.gmra.mxu3 %v169_v7  ;;  %v269_v23 = vrot.slane %v169_v7, 6  ;;  %v282_v25 = vrot.slane %v169_v7, 7 }
  0x99   :  { %517 = vmatpush.msrb.mxu0 %v474_v5 }
  0x9d   :  { %v171_v9 = vpop.f32.mrf.mxu0 }
  0x9e   :  { %v172_v10 = vadd.f32 %v171_v9, %v135_v8  ;;  %v489_v8 = vld [vmem:[#allocation5 + $0xd8] sm:$0xff]  ;;  %v472_v9 = vld [vmem:[#allocation5 + $0x50] sm:$0xff] }
  0x9f   :  { %547 = vmatpush.msrb.mxu1 %v489_v8 }
  0xa0   :  { %424 = vmatmul.f32.gmra.mxu3 %v172_v10  ;;  %v270_v32 = vrot.slane %v172_v10, 6  ;;  %v283_v33 = vrot.slane %v172_v10, 7 }
  0xa2   :  { %v276_v35 = vsel %vm273_vm3, %v269_v23, %v270_v32  ;;  %v289_v36 = vsel %vm286_vm4, %v282_v25, %v283_v33 }
  0xa5   :  { %v174_v13 = vpop.f32.mrf.mxu0 }
  0xa6   :  { %v175_v14 = vadd.f32 %v174_v13, %v136_v12  ;;  %v471_v12 = vld [vmem:[#allocation5 + $0x48] sm:$0xff] }
  0xa7   :  { %v487_v13 = vld [vmem:[#allocation5 + $0xc8] sm:$0xff] }
  0xa8   :  { %427 = vmatmul.f32.gmra.mxu3 %v175_v14  ;;  %v271_v37 = vrot.slane %v175_v14, 6  ;;  %v284_v38 = vrot.slane %v175_v14, 7 }
  0xaa   :  { %v275_v40 = vsel %vm273_vm3, %v270_v32, %v271_v37  ;;  %v288_v42 = vsel %vm286_vm4, %v283_v33, %v284_v38  ;;  %v465_v32 = vld [vmem:[#allocation5 + $0x18] sm:$0xff] }
  0xab   :  { %v280_v43 = vmul.f32 %v1552_v39, %v275_v40  ;;  %v293_v44 = vmul.f32 %v1557_v41, %v288_v42  ;;  %v481_v33 = vld [vmem:[#allocation5 + $0x98] sm:$0xff]  ;;  %v479_v40 = vld [vmem:[#allocation5 + $0x88] sm:$0xff] }
  0xad   :  { %v177_v18 = vpop.f32.mrf.mxu0 }
  0xae   :  { %v178_v19 = vadd.f32 %v177_v18, %v137_v17  ;;  %v486_v17 = vld [vmem:[#allocation5 + $0xc0] sm:$0xff]  ;;  %v469_v18 = vld [vmem:[#allocation5 + $0x38] sm:$0xff] }
  0xb0   :  { %430 = vmatmul.f32.gmra.mxu3 %v178_v19  ;;  %v272_v24 = vrot.slane %v178_v19, 6  ;;  %v285_v26 = vrot.slane %v178_v19, 7 }
  0xb2   :  { %v277_v27 = vsel %vm273_vm3, %v272_v24, %v269_v23  ;;  %v290_v28 = vsel %vm286_vm4, %v285_v26, %v282_v25  ;;  %v274_v45 = vsel %vm273_vm3, %v271_v37, %v272_v24  ;;  %v287_v46 = vsel %vm286_vm4, %v284_v38, %v285_v26  ;;  %v468_v23 = vld [vmem:[#allocation5 + $0x30] sm:$0xff]  ;;  %v467_v25 = vld [vmem:[#allocation5 + $0x28] sm:$0xff] }
  0xb3   :  { %v278_v29 = vmul.f32 %v1529_v21, %v277_v27  ;;  %v291_v30 = vmul.f32 %v1532_v22, %v290_v28  ;;  %v484_v24 = vld [vmem:[#allocation5 + $0xb0] sm:$0xff]  ;;  %v483_v26 = vld [vmem:[#allocation5 + $0xa8] sm:$0xff]  ;;  %v466_v28 = vld [vmem:[#allocation5 + $0x20] sm:$0xff] }
  0xb4   :  { %v463_v38 = vld [vmem:[#allocation5 + $0x8] sm:$0xff] }
  0xb5   :  { %363 = vmatmul.f32.vlgmr.msra.gmra.mxu1 %v278_v29  ;;  %392 = vmatmul.f32.vlgmr.msra.gmra.mxu2 %v291_v30  ;;  %v482_v29 = vld [vmem:[#allocation5 + $0xa0] sm:$0xff] }
  0xb6   :  { %v1203_v30 = vld [vmem:[%s1809_s4] ss:$0 sm:$0xff] }
  0xb8   :  { %641 = vmatmul.f32.vlgmr.msrb.gmra.mxu3 %v169_v7  ;;  %v473_v7 = vld [vmem:[#allocation5 + $0x58] sm:$0xff] }
  0xb9   :  { %518 = vmatpush.msrb.mxu0 %v473_v7 }
  0xbb   :  { %519 = vmatpush.msrb.mxu0 %v472_v9 }
  0xbd   :  { %366 = vmatmul.f32.gmra.mxu1 %v276_v35  ;;  %395 = vmatmul.f32.gmra.mxu2 %v289_v36  ;;  %v464_v35 = vld [vmem:[#allocation5 + $0x10] sm:$0xff] }
  0xbe   :  { %520 = vmatpush.msrb.mxu0 %v471_v12  ;;  %v480_v36 = vld [vmem:[#allocation5 + $0x90] sm:$0xff] }
  0xc0   :  { %644 = vmatmul.f32.gmra.mxu3 %v172_v10  ;;  %v488_v10 = vld [vmem:[#allocation5 + $0xd0] sm:$0xff] }
  0xc1   :  { %548 = vmatpush.msrb.mxu1 %v488_v10 }
  0xc3   :  { %549 = vmatpush.msrb.mxu1 %v487_v13 }
  0xc5   :  { %369 = vmatmul.f32.gmra.mxu1 %v280_v43  ;;  %398 = vmatmul.f32.gmra.mxu2 %v293_v44  ;;  %v462_v43 = vld [vmem:[#allocation5] sm:$0xff] }
  0xc6   :  { %550 = vmatpush.msrb.mxu1 %v486_v17  ;;  %v478_v44 = vld [vmem:[#allocation5 + $0x80] sm:$0xff] }
  0xc8   :  { %647 = vmatmul.f32.gmra.mxu3 %v175_v14  ;;  %v470_v14 = vld [vmem:[#allocation5 + $0x40] sm:$0xff] }
  0xc9   :  { %521 = vmatpush.msrb.mxu0 %v470_v14 }
  0xcb   :  { %522 = vmatpush.msrb.mxu0 %v469_v18 }
  0xcd   :  { %372 = vmatmul.f32.gmra.mxu1 %v274_v45  ;;  %401 = vmatmul.f32.gmra.mxu2 %v287_v46 }
  0xce   :  { %523 = vmatpush.msrb.mxu0 %v468_v23 }
  0xd0   :  { %650 = vmatmul.f32.gmra.mxu3 %v178_v19  ;;  %v485_v19 = vld [vmem:[#allocation5 + $0xb8] sm:$0xff]  ;;  %524 = vmatpush.msrb.mxu0 %v467_v25 }
  0xd1   :  { %551 = vmatpush.msrb.mxu1 %v485_v19 }
  0xd2   :  { %525 = vmatpush.msrb.mxu0 %v466_v28 }
  0xd3   :  { %552 = vmatpush.msrb.mxu1 %v484_v24 }
  0xd4   :  { %526 = vmatpush.msrb.mxu0 %v465_v32  ;;  %v732_v32 = vld [vmem:[#allocation8 + $0x168] sm:$0xff] }
  0xd5   :  { %553 = vmatpush.msrb.mxu1 %v483_v26 }
  0xd6   :  { %527 = vmatpush.msrb.mxu0 %v464_v35  ;;  %v730_v35 = vld [vmem:[#allocation8 + $0x158] sm:$0xff] }
  0xd7   :  { %554 = vmatpush.msrb.mxu1 %v482_v29 }
  0xd8   :  { %528 = vmatpush.msrb.mxu0 %v463_v38  ;;  %v726_v38 = vld [vmem:[#allocation8 + $0x138] sm:$0xff] }
  0xd9   :  { %555 = vmatpush.msrb.mxu1 %v481_v33  ;;  %v731_v33 = vld [vmem:[#allocation8 + $0x160] sm:$0xff] }
  0xda   :  { %529 = vmatpush.msrb.mxu0 %v462_v43  ;;  %v723_v43 = vld [vmem:[#allocation8 + $0x120] sm:$0xff] }
  0xdb   :  { %556 = vmatpush.msrb.mxu1 %v480_v36  ;;  %v728_v36 = vld [vmem:[#allocation8 + $0x148] sm:$0xff] }
  0xdd   :  { %557 = vmatpush.msrb.mxu1 %v479_v40  ;;  %v725_v40 = vld [vmem:[#allocation8 + $0x130] sm:$0xff] }
  0xdf   :  { %558 = vmatpush.msrb.mxu1 %v478_v44  ;;  %v722_v44 = vld [vmem:[#allocation8 + $0x118] sm:$0xff] }
 0x11b   :  { %v422_v31 = vpop.f32.mrf.mxu3 }
 0x123   :  { %v425_v49 = vpop.f32.mrf.mxu3 }
 0x12b   :  { %v428_v57 = vpop.f32.mrf.mxu3 }
 0x132   :  { %v364_v27 = vpop.f32.mrf.mxu1 }
 0x133   :  { %v365_v37 = vadd.f32 %v1203_v30, %v364_v27  ;;  %v431_v2 = vpop.f32.mrf.mxu3 }
 0x138   :  { %v393_v42 = vpop.f32.mrf.mxu2 }
 0x139   :  { %v394_v45 = vadd.f32 %v393_v42, %v365_v37  ;;  %v727_v37 = vld [vmem:[#allocation8 + $0x140] sm:$0xff]  ;;  %v724_v42 = vld [vmem:[#allocation8 + $0x128] sm:$0xff] }
 0x13a   :  { %v367_v46 = vpop.f32.mrf.mxu1 }
 0x13b   :  { %v423_v47 = vadd.f32 %v422_v31, %v394_v45  ;;  %v368_v50 = vadd.f32 %v1203_v30, %v367_v46  ;;  %v733_v31 = vld [vmem:[#allocation8 + $0x170] sm:$0xff]  ;;  %v720_v46 = vld [vmem:[#allocation8 + $0x108] sm:$0xff] }
 0x13c   :  { %v721_v45 = vld [vmem:[#allocation8 + $0x110] sm:$0xff] }
 0x13d   :  { %v434_v48 = vmax.f32 %v423_v47, 0.0  ;;  %v702_v47 = vld [vmem:[#allocation8 + $0x78] sm:$0xff] }
 0x13e   :  { %739 = vmatpush.msra.mxu0 %v702_v47 }
 0x13f   :  { %588 = vmatmul.f32.vlgmr.msrb.gmra.mxu2 %v434_v48  ;;  %v438_v5 = vrot.slane %v434_v48, 6  ;;  %v450_v6 = vrot.slane %v434_v48, 7  ;;  %v718_v48 = vld [vmem:[#allocation8 + $0xf8] sm:$0xff] }
 0x140   :  { %v396_v51 = vpop.f32.mrf.mxu2  ;;  %768 = vmatpush.msra.mxu1 %v718_v48 }
 0x141   :  { %v397_v52 = vadd.f32 %v396_v51, %v368_v50  ;;  %v701_v50 = vld [vmem:[#allocation8 + $0x70] sm:$0xff] }
 0x142   :  { %v370_v53 = vpop.f32.mrf.mxu1  ;;  %v717_v51 = vld [vmem:[#allocation8 + $0xf0] sm:$0xff]  ;;  %740 = vmatpush.msra.mxu0 %v701_v50 }
 0x143   :  { %v426_v54 = vadd.f32 %v425_v49, %v397_v52  ;;  %v371_v56 = vadd.f32 %v1203_v30, %v370_v53  ;;  %v719_v49 = vld [vmem:[#allocation8 + $0x100] sm:$0xff]  ;;  %769 = vmatpush.msra.mxu1 %v717_v51  ;;  %v700_v52 = vld [vmem:[#allocation8 + $0x68] sm:$0xff] }
 0x144   :  { %v716_v53 = vld [vmem:[#allocation8 + $0xe8] sm:$0xff]  ;;  %741 = vmatpush.msra.mxu0 %v700_v52 }
 0x145   :  { %v435_v55 = vmax.f32 %v426_v54, 0.0  ;;  %770 = vmatpush.msra.mxu1 %v716_v53  ;;  %v699_v54 = vld [vmem:[#allocation8 + $0x60] sm:$0xff] }
 0x146   :  { %742 = vmatpush.msra.mxu0 %v699_v54 }
 0x147   :  { %591 = vmatmul.f32.gmra.mxu2 %v435_v55  ;;  %v439_v14 = vrot.slane %v435_v55, 6  ;;  %v451_v17 = vrot.slane %v435_v55, 7  ;;  %v715_v55 = vld [vmem:[#allocation8 + $0xe0] sm:$0xff] }
 0x148   :  { %v399_v58 = vpop.f32.mrf.mxu2  ;;  %771 = vmatpush.msra.mxu1 %v715_v55 }
 0x149   :  { %v400_v59 = vadd.f32 %v399_v58, %v371_v56  ;;  %v444_v18 = vsel %vm273_vm3, %v438_v5, %v439_v14  ;;  %v456_v19 = vsel %vm286_vm4, %v450_v6, %v451_v17  ;;  %v698_v56 = vld [vmem:[#allocation8 + $0x58] sm:$0xff]  ;;  %v697_v58 = vld [vmem:[#allocation8 + $0x50] sm:$0xff] }
 0x14a   :  { %v373_v61 = vpop.f32.mrf.mxu1  ;;  %743 = vmatpush.msra.mxu0 %v698_v56 }
 0x14b   :  { %v429_v60 = vadd.f32 %v428_v57, %v400_v59  ;;  %v374_v63 = vadd.f32 %v1203_v30, %v373_v61  ;;  %v734_v30 = vld [vmem:[#allocation8 + $0x178] sm:$0xff]  ;;  %v713_v59 = vld [vmem:[#allocation8 + $0xd0] sm:$0xff]  ;;  %v712_v61 = vld [vmem:[#allocation8 + $0xc8] sm:$0xff] }
 0x14c   :  { %797 = vmatpush.msra.mxu2 %v734_v30  ;;  %v714_v57 = vld [vmem:[#allocation8 + $0xd8] sm:$0xff]  ;;  %744 = vmatpush.msra.mxu0 %v697_v58 }
 0x14d   :  { %v436_v62 = vmax.f32 %v429_v60, 0.0  ;;  %772 = vmatpush.msra.mxu1 %v714_v57  ;;  %v696_v60 = vld [vmem:[#allocation8 + $0x48] sm:$0xff] }
 0x14e   :  { %798 = vmatpush.msra.mxu2 %v733_v31  ;;  %745 = vmatpush.msra.mxu0 %v696_v60 }
 0x14f   :  { %594 = vmatmul.f32.gmra.mxu2 %v436_v62  ;;  %v440_v23 = vrot.slane %v436_v62, 6  ;;  %v452_v24 = vrot.slane %v436_v62, 7  ;;  %773 = vmatpush.msra.mxu1 %v713_v59  ;;  %v695_v62 = vld [vmem:[#allocation8 + $0x40] sm:$0xff] }
 0x150   :  { %v402_v0 = vpop.f32.mrf.mxu2  ;;  %799 = vmatpush.msra.mxu2 %v732_v32  ;;  %746 = vmatpush.msra.mxu0 %v695_v62 }
 0x151   :  { %v403_v1 = vadd.f32 %v402_v0, %v374_v63  ;;  %v443_v25 = vsel %vm273_vm3, %v439_v14, %v440_v23  ;;  %774 = vmatpush.msra.mxu1 %v712_v61  ;;  %v711_v63 = vld [vmem:[#allocation8 + $0xc0] sm:$0xff]  ;;  %v694_v0 = vld [vmem:[#allocation8 + $0x38] sm:$0xff] }
 0x152   :  { %v448_v26 = vmul.f32 %v1552_v39, %v443_v25  ;;  %800 = vmatpush.msra.mxu2 %v731_v33  ;;  %747 = vmatpush.msra.mxu0 %v694_v0  ;;  %v705_v25 = vld [vmem:[#allocation8 + $0x90] sm:$0xff] }
 0x153   :  { %v432_v3 = vadd.f32 %v431_v2, %v403_v1  ;;  %775 = vmatpush.msra.mxu1 %v711_v63  ;;  %v710_v1 = vld [vmem:[#allocation8 + $0xb8] sm:$0xff]  ;;  %v693_v2 = vld [vmem:[#allocation8 + $0x30] sm:$0xff] }
 0x154   :  { %801 = vmatpush.msra.mxu2 %v730_v35  ;;  %748 = vmatpush.msra.mxu0 %v693_v2 }
 0x155   :  { %v437_v4 = vmax.f32 %v432_v3, 0.0  ;;  %776 = vmatpush.msra.mxu1 %v710_v1  ;;  %v709_v3 = vld [vmem:[#allocation8 + $0xb0] sm:$0xff] }
 0x157   :  { %v441_v7 = vrot.slane %v437_v4, 6  ;;  %v453_v8 = vrot.slane %v437_v4, 7  ;;  %597 = vmatmul.f32.gmra.mxu2 %v437_v4  ;;  %v642_v4 = vpop.f32.mrf.mxu3  ;;  %777 = vmatpush.msra.mxu1 %v709_v3 }
 0x159   :  { %v445_v9 = vsel %vm273_vm3, %v441_v7, %v438_v5  ;;  %v457_v10 = vsel %vm286_vm4, %v453_v8, %v450_v6  ;;  %v442_v28 = vsel %vm273_vm3, %v440_v23, %v441_v7  ;;  %v454_v29 = vsel %vm286_vm4, %v452_v24, %v453_v8  ;;  %v1205_v6 = vld [vmem:[%s1811_s6] ss:$0 sm:$0xff]  ;;  %v692_v7 = vld [vmem:[#allocation8 + $0x28] sm:$0xff] }
 0x15a   :  { %v446_v12 = vmul.f32 %v1529_v21, %v445_v9  ;;  %v458_v13 = vmul.f32 %v1532_v22, %v457_v10  ;;  %v455_v22 = vsel %vm286_vm4, %v451_v17, %v452_v24  ;;  %v708_v8 = vld [vmem:[#allocation8 + $0xa8] sm:$0xff]  ;;  %749 = vmatpush.msra.mxu0 %v692_v7  ;;  %v690_v17 = vld [vmem:[#allocation8 + $0x18] sm:$0xff]  ;;  %v689_v24 = vld [vmem:[#allocation8 + $0x10] sm:$0xff] }
 0x15b   :  { %v460_v27 = vmul.f32 %v1557_v41, %v455_v22  ;;  %v729_v41 = vld [vmem:[#allocation8 + $0x150] sm:$0xff]  ;;  %778 = vmatpush.msra.mxu1 %v708_v8 }
 0x15c   :  { %530 = vmatmul.f32.vlgmr.msrb.gmra.mxu0 %v446_v12  ;;  %559 = vmatmul.f32.vlgmr.msrb.gmra.mxu1 %v458_v13  ;;  %v691_v12 = vld [vmem:[#allocation8 + $0x20] sm:$0xff] }
 0x15d   :  { %802 = vmatpush.msra.mxu2 %v729_v41  ;;  %v707_v13 = vld [vmem:[#allocation8 + $0xa0] sm:$0xff]  ;;  %750 = vmatpush.msra.mxu0 %v691_v12 }
 0x15e   :  { %779 = vmatpush.msra.mxu1 %v707_v13 }
 0x15f   :  { %803 = vmatpush.msra.mxu2 %v728_v36  ;;  %751 = vmatpush.msra.mxu0 %v690_v17  ;;  %v645_v31 = vpop.f32.mrf.mxu3 }
 0x161   :  { %804 = vmatpush.msra.mxu2 %v727_v37  ;;  %752 = vmatpush.msra.mxu0 %v689_v24 }
 0x163   :  { %805 = vmatpush.msra.mxu2 %v726_v38 }
 0x164   :  { %533 = vmatmul.f32.gmra.mxu0 %v444_v18  ;;  %562 = vmatmul.f32.gmra.mxu1 %v456_v19  ;;  %v706_v18 = vld [vmem:[#allocation8 + $0x98] sm:$0xff]  ;;  %v1204_v19 = vld [vmem:[%s1813_s8] ss:$0 sm:$0xff] }
 0x165   :  { %806 = vmatpush.msra.mxu2 %v725_v40  ;;  %780 = vmatpush.msra.mxu1 %v706_v18  ;;  %v643_v30 = vadd.f32 %v1204_v19, %v642_v4 }
 0x167   :  { %807 = vmatpush.msra.mxu2 %v724_v42  ;;  %781 = vmatpush.msra.mxu1 %v705_v25  ;;  %v1633_v25 = vsel %vm259_vm9, 1.0, %v1377_v20 }
 0x169   :  { %808 = vmatpush.msra.mxu2 %v723_v43  ;;  %v646_v43 = vadd.f32 %v1204_v19, %v645_v31  ;;  %v1647_v31 = vld [vmem:[#allocation10 + $0x170] sm:$0xff] }
 0x16b   :  { %809 = vmatpush.msra.mxu2 %v722_v44 }
 0x16c   :  { %536 = vmatmul.f32.gmra.mxu0 %v448_v26  ;;  %565 = vmatmul.f32.gmra.mxu1 %v460_v27  ;;  %v688_v26 = vld [vmem:[#allocation8 + $0x8] sm:$0xff] }
 0x16d   :  { %810 = vmatpush.msra.mxu2 %v721_v45  ;;  %v704_v27 = vld [vmem:[#allocation8 + $0x88] sm:$0xff]  ;;  %753 = vmatpush.msra.mxu0 %v688_v26 }
 0x16e   :  { %782 = vmatpush.msra.mxu1 %v704_v27 }
 0x16f   :  { %811 = vmatpush.msra.mxu2 %v720_v46 }
 0x171   :  { %812 = vmatpush.msra.mxu2 %v719_v49  ;;  %v648_v49 = vpop.f32.mrf.mxu3 }
 0x172   :  { %v649_v54 = vadd.f32 %v1204_v19, %v648_v49  ;;  %v1693_v49 = vld [vmem:[#allocation10 + $0x118] sm:$0xff] }
 0x174   :  { %539 = vmatmul.f32.gmra.mxu0 %v442_v28  ;;  %568 = vmatmul.f32.gmra.mxu1 %v454_v29  ;;  %v687_v28 = vld [vmem:[#allocation8] sm:$0xff] }
 0x175   :  { %v703_v29 = vld [vmem:[#allocation8 + $0x80] sm:$0xff]  ;;  %754 = vmatpush.msra.mxu0 %v687_v28 }
 0x176   :  { %783 = vmatpush.msra.mxu1 %v703_v29 }
 0x179   :  { %v651_v62 = vpop.f32.mrf.mxu3 }
 0x17a   :  { %v652_v1 = vadd.f32 %v1204_v19, %v651_v62  ;;  %v864_v62 = vld [vmem:[#allocation10 + $0x50] sm:$0xff] }
 0x1c2   :  { %v589_v5 = vpop.f32.mrf.mxu2 }
 0x1ca   :  { %v592_v32 = vpop.f32.mrf.mxu2 }
 0x1d2   :  { %v595_v50 = vpop.f32.mrf.mxu2 }
 0x1d9   :  { %v531_v9 = vpop.f32.mrf.mxu0  ;;  %v560_v10 = vpop.f32.mrf.mxu1 }
 0x1da   :  { %v532_v14 = vadd.f32 %v1205_v6, %v531_v9  ;;  %v598_v63 = vpop.f32.mrf.mxu2 }
 0x1dc   :  { %v561_v23 = vadd.f32 %v560_v10, %v532_v14 }
 0x1de   :  { %v590_v22 = vadd.f32 %v589_v5, %v561_v23  ;;  %v1609_v5 = vsel %vm257_vm7, 1.0, %v1377_v20 }
 0x1e0   :  { %v601_v33 = vmax.f32 %v590_v22, 0.0 }
 0x1e1   :  { %v534_v35 = vpop.f32.mrf.mxu0  ;;  %v563_v41 = vpop.f32.mrf.mxu1 }
 0x1e2   :  { %v654_v36 = vadd.f32 %v643_v30, %v601_v33  ;;  %v535_v37 = vadd.f32 %v1205_v6, %v534_v35  ;;  %v1645_v30 = vld [vmem:[#allocation10 + $0x178] sm:$0xff]  ;;  %v1655_v33 = vld [vmem:[#allocation10 + $0x160] sm:$0xff] }
 0x1e3   :  { %1146 = vmatpush.msrb.mxu1 %v1645_v30  ;;  %1147 = vmatpush.msrb.mxu2 %v1645_v30  ;;  %v1661_v35 = vld [vmem:[#allocation10 + $0x158] sm:$0xff] }
 0x1e4   :  { %v1596_v38 = vmax.f32 %v654_v36, 0.0  ;;  %v564_v40 = vadd.f32 %v563_v41, %v535_v37  ;;  %v1663_v41 = vld [vmem:[#allocation10 + $0x150] sm:$0xff]  ;;  %v1667_v36 = vld [vmem:[#allocation10 + $0x148] sm:$0xff]  ;;  %v1673_v37 = vld [vmem:[#allocation10 + $0x140] sm:$0xff] }
 0x1e5   :  { %1149 = vmatpush.msrb.mxu1 %v1647_v31  ;;  %1150 = vmatpush.msrb.mxu2 %v1647_v31 }
 0x1e6   :  { %v593_v42 = vadd.f32 %v592_v32, %v564_v40  ;;  %813 = vmatmul.f32.vlgmr.msra.gmra.mxu2 %v1596_v38  ;;  %v675_v8 = vrot.slane %v1596_v38, 6  ;;  %v1651_v32 = vld [vmem:[#allocation10 + $0x168] sm:$0xff]  ;;  %v1677_v40 = vld [vmem:[#allocation10 + $0x138] sm:$0xff] }
 0x1e7   :  { %1152 = vmatpush.msrb.mxu1 %v1651_v32  ;;  %1153 = vmatpush.msrb.mxu2 %v1651_v32 }
 0x1e8   :  { %v602_v44 = vmax.f32 %v593_v42, 0.0  ;;  %v1681_v42 = vld [vmem:[#allocation10 + $0x130] sm:$0xff] }
 0x1e9   :  { %v537_v45 = vpop.f32.mrf.mxu0  ;;  %v566_v46 = vpop.f32.mrf.mxu1  ;;  %1155 = vmatpush.msrb.mxu1 %v1655_v33  ;;  %1156 = vmatpush.msrb.mxu2 %v1655_v33 }
 0x1ea   :  { %v655_v47 = vadd.f32 %v646_v43, %v602_v44  ;;  %v538_v48 = vadd.f32 %v1205_v6, %v537_v45  ;;  %v1685_v43 = vld [vmem:[#allocation10 + $0x128] sm:$0xff]  ;;  %v885_v44 = vld [vmem:[#allocation10 + $0xf8] sm:$0xff] }
 0x1eb   :  { %1158 = vmatpush.msrb.mxu1 %v1661_v35  ;;  %1159 = vmatpush.msrb.mxu2 %v1661_v35  ;;  %v869_v45 = vld [vmem:[#allocation10 + $0x78] sm:$0xff] }
 0x1ec   :  { %v1599_v51 = vmax.f32 %v655_v47, 0.0  ;;  %v567_v52 = vadd.f32 %v566_v46, %v538_v48  ;;  %935 = vmatpush.msrb.mxu0 %v885_v44  ;;  %906 = vmatpush.msra.mxu3 %v869_v45  ;;  %v1689_v46 = vld [vmem:[#allocation10 + $0x120] sm:$0xff]  ;;  %v884_v47 = vld [vmem:[#allocation10 + $0xf0] sm:$0xff] }
 0x1ed   :  { %1161 = vmatpush.msrb.mxu1 %v1663_v41  ;;  %1162 = vmatpush.msrb.mxu2 %v1663_v41  ;;  %v868_v48 = vld [vmem:[#allocation10 + $0x70] sm:$0xff] }
 0x1ee   :  { %v596_v53 = vadd.f32 %v595_v50, %v567_v52  ;;  %816 = vmatmul.f32.gmra.mxu2 %v1599_v51  ;;  %v663_v14 = vrot.slane %v1599_v51, 4  ;;  %v676_v17 = vrot.slane %v1599_v51, 6  ;;  %936 = vmatpush.msrb.mxu0 %v884_v47  ;;  %v883_v50 = vld [vmem:[#allocation10 + $0xe8] sm:$0xff] }
 0x1ef   :  { %1164 = vmatpush.msrb.mxu1 %v1667_v36  ;;  %1165 = vmatpush.msrb.mxu2 %v1667_v36  ;;  %v867_v52 = vld [vmem:[#allocation10 + $0x68] sm:$0xff] }
 0x1f0   :  { %v603_v55 = vmax.f32 %v596_v53, 0.0  ;;  %v681_v19 = vsel %vm273_vm3, %v675_v8, %v676_v17  ;;  %907 = vmatpush.msra.mxu3 %v868_v48  ;;  %937 = vmatpush.msrb.mxu0 %v883_v50  ;;  %v1697_v53 = vld [vmem:[#allocation10 + $0x110] sm:$0xff] }
 0x1f1   :  { %v540_v56 = vpop.f32.mrf.mxu0  ;;  %v569_v59 = vpop.f32.mrf.mxu1  ;;  %1167 = vmatpush.msrb.mxu1 %v1673_v37  ;;  %1168 = vmatpush.msrb.mxu2 %v1673_v37 }
 0x1f2   :  { %v656_v57 = vadd.f32 %v649_v54, %v603_v55  ;;  %v541_v58 = vadd.f32 %v1205_v6, %v540_v56  ;;  %v662_v6 = vrot.slane %v1596_v38, 4  ;;  %908 = vmatpush.msra.mxu3 %v867_v52  ;;  %v882_v54 = vld [vmem:[#allocation10 + $0xe0] sm:$0xff]  ;;  %v1701_v56 = vld [vmem:[#allocation10 + $0x108] sm:$0xff] }
 0x1f3   :  { %1170 = vmatpush.msrb.mxu1 %v1677_v40  ;;  %1171 = vmatpush.msrb.mxu2 %v1677_v40  ;;  %v866_v55 = vld [vmem:[#allocation10 + $0x60] sm:$0xff] }
 0x1f4   :  { %v1602_v60 = vmax.f32 %v656_v57, 0.0  ;;  %v570_v61 = vadd.f32 %v569_v59, %v541_v58  ;;  %v669_v18 = vsel %vm666_vm8, %v662_v6, %v663_v14  ;;  %938 = vmatpush.msrb.mxu0 %v882_v54  ;;  %909 = vmatpush.msra.mxu3 %v866_v55  ;;  %v881_v57 = vld [vmem:[#allocation10 + $0xd8] sm:$0xff]  ;;  %v1705_v59 = vld [vmem:[#allocation10 + $0x100] sm:$0xff] }
 0x1f5   :  { %1173 = vmatpush.msrb.mxu1 %v1681_v42  ;;  %1174 = vmatpush.msrb.mxu2 %v1681_v42  ;;  %v865_v58 = vld [vmem:[#allocation10 + $0x58] sm:$0xff] }
 0x1f6   :  { %v599_v0 = vadd.f32 %v598_v63, %v570_v61  ;;  %819 = vmatmul.f32.gmra.mxu2 %v1602_v60  ;;  %v664_v23 = vrot.slane %v1602_v60, 4  ;;  %v677_v24 = vrot.slane %v1602_v60, 6  ;;  %939 = vmatpush.msrb.mxu0 %v881_v57  ;;  %v880_v61 = vld [vmem:[#allocation10 + $0xd0] sm:$0xff]  ;;  %v879_v63 = vld [vmem:[#allocation10 + $0xc8] sm:$0xff] }
 0x1f7   :  { %1176 = vmatpush.msrb.mxu1 %v1685_v43  ;;  %1177 = vmatpush.msrb.mxu2 %v1685_v43 }
 0x1f8   :  { %v604_v2 = vmax.f32 %v599_v0, 0.0  ;;  %v668_v22 = vsel %vm666_vm8, %v663_v14, %v664_v23  ;;  %v680_v26 = vsel %vm273_vm3, %v676_v17, %v677_v24  ;;  %910 = vmatpush.msra.mxu3 %v865_v58  ;;  %940 = vmatpush.msrb.mxu0 %v880_v61  ;;  %v863_v0 = vld [vmem:[#allocation10 + $0x48] sm:$0xff]  ;;  %v873_v14 = vld [vmem:[#allocation10 + $0x98] sm:$0xff] }
 0x1f9   :  { %v673_v27 = vmul.f32 %v1633_v25, %v668_v22  ;;  %v685_v28 = vmul.f32 %v1552_v39, %v680_v26  ;;  %1179 = vmatpush.msrb.mxu1 %v1689_v46  ;;  %1180 = vmatpush.msrb.mxu2 %v1689_v46  ;;  %v857_v17 = vld [vmem:[#allocation10 + $0x18] sm:$0xff]  ;;  %v871_v22 = vld [vmem:[#allocation10 + $0x88] sm:$0xff] }
 0x1fa   :  { %v657_v3 = vadd.f32 %v652_v1, %v604_v2  ;;  %911 = vmatpush.msra.mxu3 %v864_v62  ;;  %941 = vmatpush.msrb.mxu0 %v879_v63  ;;  %v878_v1 = vld [vmem:[#allocation10 + $0xc0] sm:$0xff]  ;;  %v855_v26 = vld [vmem:[#allocation10 + $0x8] sm:$0xff] }
 0x1fb   :  { %1182 = vmatpush.msrb.mxu1 %v1693_v49  ;;  %1183 = vmatpush.msrb.mxu2 %v1693_v49  ;;  %v862_v2 = vld [vmem:[#allocation10 + $0x40] sm:$0xff] }
 0x1fc   :  { %v1606_v4 = vmax.f32 %v657_v3, 0.0  ;;  %912 = vmatpush.msra.mxu3 %v863_v0  ;;  %942 = vmatpush.msrb.mxu0 %v878_v1  ;;  %v877_v3 = vld [vmem:[#allocation10 + $0xb8] sm:$0xff] }
 0x1fd   :  { %1185 = vmatpush.msrb.mxu1 %v1697_v53  ;;  %1186 = vmatpush.msrb.mxu2 %v1697_v53 }
 0x1fe   :  { %822 = vmatmul.f32.gmra.mxu2 %v1606_v4  ;;  %v665_v7 = vrot.slane %v1606_v4, 4  ;;  %v678_v9 = vrot.slane %v1606_v4, 6  ;;  %913 = vmatpush.msra.mxu3 %v862_v2 }
 0x1ff   :  { %1188 = vmatpush.msrb.mxu1 %v1701_v56  ;;  %1189 = vmatpush.msrb.mxu2 %v1701_v56 }
 0x200   :  { %v670_v16 = vsel %vm666_vm8, %v665_v7, %v662_v6  ;;  %v682_v10 = vsel %vm273_vm3, %v678_v9, %v675_v8  ;;  %v667_v29 = vsel %vm666_vm8, %v664_v23, %v665_v7  ;;  %v679_v34 = vsel %vm273_vm3, %v677_v24, %v678_v9  ;;  %v861_v6 = vld [vmem:[#allocation10 + $0x38] sm:$0xff]  ;;  %943 = vmatpush.msrb.mxu0 %v877_v3  ;;  %v876_v7 = vld [vmem:[#allocation10 + $0xb0] sm:$0xff]  ;;  %v875_v9 = vld [vmem:[#allocation10 + $0xa8] sm:$0xff] }
 0x201   :  { %v671_v12 = vmul.f32 %v1609_v5, %v670_v16  ;;  %v683_v13 = vmul.f32 %v1529_v21, %v682_v10  ;;  %1191 = vmatpush.msrb.mxu1 %v1705_v59  ;;  %1192 = vmatpush.msrb.mxu2 %v1705_v59  ;;  %v860_v8 = vld [vmem:[#allocation10 + $0x30] sm:$0xff]  ;;  %v859_v16 = vld [vmem:[#allocation10 + $0x28] sm:$0xff]  ;;  %v874_v10 = vld [vmem:[#allocation10 + $0xa0] sm:$0xff] }
 0x202   :  { %914 = vmatpush.msra.mxu3 %v861_v6  ;;  %944 = vmatpush.msrb.mxu0 %v876_v7  ;;  %v872_v23 = vld [vmem:[#allocation10 + $0x90] sm:$0xff] }
 0x203   :  { %755 = vmatmul.f32.vlgmr.msra.gmra.mxu0 %v671_v12  ;;  %784 = vmatmul.f32.vlgmr.msra.gmra.mxu1 %v683_v13  ;;  %v858_v12 = vld [vmem:[#allocation10 + $0x20] sm:$0xff]  ;;  %v856_v24 = vld [vmem:[#allocation10 + $0x10] sm:$0xff] }
 0x204   :  { %915 = vmatpush.msra.mxu3 %v860_v8  ;;  %945 = vmatpush.msrb.mxu0 %v875_v9 }
 0x206   :  { %916 = vmatpush.msra.mxu3 %v859_v16  ;;  %946 = vmatpush.msrb.mxu0 %v874_v10 }
 0x208   :  { %917 = vmatpush.msra.mxu3 %v858_v12  ;;  %947 = vmatpush.msrb.mxu0 %v873_v14 }
 0x20a   :  { %918 = vmatpush.msra.mxu3 %v857_v17  ;;  %948 = vmatpush.msrb.mxu0 %v872_v23 }
 0x20b   :  { %758 = vmatmul.f32.gmra.mxu0 %v669_v18  ;;  %787 = vmatmul.f32.gmra.mxu1 %v681_v19 }
 0x20c   :  { %919 = vmatpush.msra.mxu3 %v856_v24  ;;  %949 = vmatpush.msrb.mxu0 %v871_v22 }
 0x20e   :  { %920 = vmatpush.msra.mxu3 %v855_v26 }
 0x213   :  { %761 = vmatmul.f32.gmra.mxu0 %v673_v27  ;;  %790 = vmatmul.f32.gmra.mxu1 %v685_v28  ;;  %v870_v27 = vld [vmem:[#allocation10 + $0x80] sm:$0xff] }
 0x214   :  { %v854_v28 = vld [vmem:[#allocation10] sm:$0xff]  ;;  %950 = vmatpush.msrb.mxu0 %v870_v27 }
 0x215   :  { %921 = vmatpush.msra.mxu3 %v854_v28 }
 0x216   :  { %964 = vmatpush.msra.mxu0 %v1645_v30 }
 0x217   :  { %1148 = vmatpush.msrb.mxu3 %v1645_v30 }
 0x218   :  { %965 = vmatpush.msra.mxu0 %v1647_v31 }
 0x219   :  { %1151 = vmatpush.msrb.mxu3 %v1647_v31 }
 0x21a   :  { %966 = vmatpush.msra.mxu0 %v1651_v32 }
 0x21b   :  { %764 = vmatmul.f32.gmra.mxu0 %v667_v29  ;;  %793 = vmatmul.f32.gmra.mxu1 %v679_v34  ;;  %v1206_v34 = vld [vmem:[%s1815_s10] ss:$0 sm:$0xff] }
 0x21c   :  { %1154 = vmatpush.msrb.mxu3 %v1651_v32  ;;  %967 = vmatpush.msra.mxu0 %v1655_v33 }
 0x21e   :  { %1157 = vmatpush.msrb.mxu3 %v1655_v33  ;;  %968 = vmatpush.msra.mxu0 %v1661_v35 }
 0x220   :  { %1160 = vmatpush.msrb.mxu3 %v1661_v35  ;;  %969 = vmatpush.msra.mxu0 %v1663_v41 }
 0x222   :  { %1163 = vmatpush.msrb.mxu3 %v1663_v41  ;;  %970 = vmatpush.msra.mxu0 %v1667_v36 }
 0x224   :  { %1166 = vmatpush.msrb.mxu3 %v1667_v36  ;;  %971 = vmatpush.msra.mxu0 %v1673_v37 }
 0x226   :  { %1169 = vmatpush.msrb.mxu3 %v1673_v37  ;;  %972 = vmatpush.msra.mxu0 %v1677_v40 }
 0x228   :  { %1172 = vmatpush.msrb.mxu3 %v1677_v40  ;;  %973 = vmatpush.msra.mxu0 %v1681_v42 }
 0x22a   :  { %1175 = vmatpush.msrb.mxu3 %v1681_v42  ;;  %974 = vmatpush.msra.mxu0 %v1685_v43 }
 0x22c   :  { %1178 = vmatpush.msrb.mxu3 %v1685_v43  ;;  %975 = vmatpush.msra.mxu0 %v1689_v46 }
 0x22e   :  { %1181 = vmatpush.msrb.mxu3 %v1689_v46  ;;  %976 = vmatpush.msra.mxu0 %v1693_v49 }
 0x230   :  { %1184 = vmatpush.msrb.mxu3 %v1693_v49  ;;  %977 = vmatpush.msra.mxu0 %v1697_v53 }
 0x232   :  { %1187 = vmatpush.msrb.mxu3 %v1697_v53  ;;  %978 = vmatpush.msra.mxu0 %v1701_v56 }
 0x234   :  { %1190 = vmatpush.msrb.mxu3 %v1701_v56  ;;  %979 = vmatpush.msra.mxu0 %v1705_v59 }
 0x236   :  { %1193 = vmatpush.msrb.mxu3 %v1705_v59 }
 0x269   :  { %v814_v13 = vpop.f32.mrf.mxu2 }
 0x271   :  { %v817_v29 = vpop.f32.mrf.mxu2 }
 0x279   :  { %v820_v55 = vpop.f32.mrf.mxu2 }
 0x280   :  { %v756_v18 = vpop.f32.mrf.mxu0  ;;  %v785_v19 = vpop.f32.mrf.mxu1 }
 0x281   :  { %v757_v31 = vadd.f32 %v1206_v34, %v756_v18  ;;  %v823_v63 = vpop.f32.mrf.mxu2 }
 0x283   :  { %v786_v35 = vadd.f32 %v785_v19, %v757_v31 }
 0x285   :  { %v815_v61 = vadd.f32 %v814_v13, %v786_v35 }
 0x287   :  { %v826_v40 = vmax.f32 %v815_v61, 0.0 }
 0x288   :  { %v759_v44 = vpop.f32.mrf.mxu0  ;;  %v788_v45 = vpop.f32.mrf.mxu1 }
 0x289   :  { %v760_v47 = vadd.f32 %v1206_v34, %v759_v44  ;;  %v830_v1 = vrot.slane %v826_v40, 4  ;;  %v842_v2 = vrot.slane %v826_v40, 6 }
 0x28b   :  { %v789_v48 = vadd.f32 %v788_v45, %v760_v47 }
 0x28d   :  { %v818_v30 = vadd.f32 %v817_v29, %v789_v48 }
 0x28f   :  { %v1722_v50 = vmax.f32 %v818_v30, 0.0 }
 0x290   :  { %v762_v52 = vpop.f32.mrf.mxu0  ;;  %v791_v54 = vpop.f32.mrf.mxu1 }
 0x291   :  { %v763_v32 = vadd.f32 %v1206_v34, %v762_v52  ;;  %983 = vmatmul.f32.vlgmr.msrb.gmra.mxu1 %v1722_v50  ;;  %v831_v53 = vrot.slane %v1722_v50, 4  ;;  %v843_v56 = vrot.slane %v1722_v50, 6 }
 0x293   :  { %v792_v33 = vadd.f32 %v791_v54, %v763_v32  ;;  %v836_v8 = vsel %vm666_vm8, %v830_v1, %v831_v53  ;;  %v848_v9 = vsel %vm273_vm3, %v842_v2, %v843_v56 }
 0x295   :  { %v821_v57 = vadd.f32 %v820_v55, %v792_v33 }
 0x297   :  { %v828_v41 = vmax.f32 %v821_v57, 0.0 }
 0x298   :  { %v765_v58 = vpop.f32.mrf.mxu0  ;;  %v794_v36 = vpop.f32.mrf.mxu1 }
 0x299   :  { %v766_v62 = vadd.f32 %v1206_v34, %v765_v58  ;;  %986 = vmatmul.f32.vlgmr.msrb.gmra.mxu2 %v828_v41  ;;  %v832_v16 = vrot.slane %v828_v41, 4 }
 0x29b   :  { %v795_v37 = vadd.f32 %v794_v36, %v766_v62 }
 0x29d   :  { %v824_v0 = vadd.f32 %v823_v63, %v795_v37 }
 0x29f   :  { %v829_v42 = vmax.f32 %v824_v0, 0.0  ;;  %v1018_v0 = vand.u32 127, %v180_v11 }
 0x2a1   :  { %v833_v43 = vrot.slane %v829_v42, 4  ;;  %v845_v3 = vrot.slane %v829_v42, 6  ;;  %vm1019_vm10 = vcmp.lt.s32.totalorder %v1018_v0, 16 }
 0x2a3   :  { %v837_v46 = vsel %vm666_vm8, %v833_v43, %v830_v1  ;;  %v849_v6 = vsel %vm273_vm3, %v845_v3, %v842_v2  ;;  %v834_v13 = vsel %vm666_vm8, %v832_v16, %v833_v43 }
 0x2a4   :  { %v838_v49 = vmul.f32 %v1609_v5, %v837_v46  ;;  %v850_v7 = vmul.f32 %v1529_v21, %v849_v6  ;;  %v844_v5 = vrot.slane %v828_v41, 6  ;;  %v835_v21 = vsel %vm666_vm8, %v831_v53, %v832_v16 }
 0x2a5   :  { %v840_v10 = vmul.f32 %v1633_v25, %v835_v21 }
 0x2a6   :  { %922 = vmatmul.f32.vlgmr.msra.gmra.mxu3 %v838_v49  ;;  %951 = vmatmul.f32.vlgmr.msrb.gmra.mxu0 %v850_v7  ;;  %v847_v59 = vsel %vm273_vm3, %v843_v56, %v844_v5  ;;  %v846_v14 = vsel %vm273_vm3, %v844_v5, %v845_v3 }
 0x2a7   :  { %v852_v12 = vmul.f32 %v1552_v39, %v847_v59  ;;  %v1207_v39 = vld [vmem:[%s1817_s12] ss:$0 sm:$0xff] }
 0x2ae   :  { %925 = vmatmul.f32.gmra.mxu3 %v836_v8  ;;  %954 = vmatmul.f32.gmra.mxu0 %v848_v9 }
 0x2b6   :  { %928 = vmatmul.f32.gmra.mxu3 %v840_v10  ;;  %957 = vmatmul.f32.gmra.mxu0 %v852_v12 }
 0x2be   :  { %931 = vmatmul.f32.gmra.mxu3 %v834_v13  ;;  %960 = vmatmul.f32.gmra.mxu0 %v846_v14 }
 0x2c6   :  { %980 = vmatmul.f32.vlgmr.msra.gmra.mxu0 %v826_v40  ;;  %989 = vmatmul.f32.vlgmr.msrb.gmra.mxu3 %v829_v42 }
 0x30e   :  { %v984_v32 = vpop.f32.mrf.mxu1 }
 0x31c   :  { %v987_v28 = vpop.f32.mrf.mxu2 }
 0x323   :  { %v952_v17 = vpop.f32.mrf.mxu0 }
 0x329   :  { %v923_v18 = vpop.f32.mrf.mxu3 }
 0x32a   :  { %v924_v15 = vadd.f32 %v1207_v39, %v923_v18 }
 0x32b   :  { %v955_v19 = vpop.f32.mrf.mxu0 }
 0x32c   :  { %v953_v48 = vadd.f32 %v952_v17, %v924_v15 }
 0x331   :  { %v926_v23 = vpop.f32.mrf.mxu3 }
 0x332   :  { %v927_v29 = vadd.f32 %v1207_v39, %v926_v23 }
 0x333   :  { %v958_v24 = vpop.f32.mrf.mxu0 }
 0x334   :  { %v956_v47 = vadd.f32 %v955_v19, %v927_v29 }
 0x336   :  { %v985_v33 = vadd.f32 %v984_v32, %v956_v47  ;;  %v1208_v47 = vld [vmem:[%s1818_s13] ss:$0 sm:$0xff]  ;;  %s1378_s13 = smov [#allocation11]  }
 0x338   :  { %v994_v62 = vmax.f32 %v985_v33, 0.0 }
 0x339   :  { %v929_v25 = vpop.f32.mrf.mxu3 }
 0x33a   :  { %v930_v22 = vadd.f32 %v1207_v39, %v929_v25 }
 0x33b   :  { %v961_v26 = vpop.f32.mrf.mxu0 }
 0x33c   :  { %v959_v27 = vadd.f32 %v958_v24, %v930_v22 }
 0x33e   :  { %v988_v34 = vadd.f32 %v987_v28, %v959_v27 }
 0x340   :  { %v995_v44 = vmax.f32 %v988_v34, 0.0 }
 0x341   :  { %v932_v45 = vpop.f32.mrf.mxu3 }
 0x342   :  { %v999_v30 = vadd.f32 %v995_v44, %v1602_v60  ;;  %v933_v52 = vadd.f32 %v1207_v39, %v932_v45  ;;  %v998_v60 = vadd.f32 %v994_v62, %v1599_v51 }
 0x343   :  { %v981_v50 = vpop.f32.mrf.mxu0 }
 0x344   :  { %v982_v54 = vadd.f32 %v981_v50, %v953_v48  ;;  %v1003_v31 = vmax.f32 %v999_v30, 0.0  ;;  %v962_v35 = vadd.f32 %v961_v26, %v933_v52  ;;  %v1002_v40 = vmax.f32 %v998_v60, 0.0  ;;  %v1209_v52 = vld [vmem:[%s1819_s14] ss:$0 sm:$0xff]  ;;  %s1118_s14 = sshll.u32 %s1378_s13, 4  ;;  %s1119_s14 = int_to_ptr.vmem [resolvable:$true] %s1118_s14 }
 0x346   :  { %v993_v55 = vmax.f32 %v982_v54, 0.0  ;;  %1009 = vadd.xlane.f32.xlu1 %v1003_v31 }
 0x348   :  { %v997_v57 = vadd.f32 %v993_v55, %v1596_v38  ;;  %v1145_v38 = vsel %vm1019_vm10, 1.0, %v1377_v20 }
 0x349   :  { %v990_v41 = vpop.f32.mrf.mxu3 }
 0x34a   :  { %v991_v58 = vadd.f32 %v990_v41, %v962_v35  ;;  %v1001_v61 = vmax.f32 %v997_v57, 0.0 }
 0x34c   :  { %v996_v36 = vmax.f32 %v991_v58, 0.0  ;;  %1005 = vadd.xlane.f32.xlu0 %v1001_v61 }
 0x34e   :  { %v1000_v37 = vadd.f32 %v996_v36, %v1606_v4 }
 0x350   :  { %v1004_v63 = vmax.f32 %v1000_v37, 0.0 }
 0x352   :  { %1011 = vadd.xlane.f32.xlu1 %v1004_v63 }
 0x354   :  { %1007 = vadd.xlane.f32.xlu0 %v1002_v40 }
 0x3b9   :  { %v1010_v42 = vpop.xlane.xlu1 %1009 }
 0x3ba   :  { %v1015_v1 = vmul.f32 0.0625, %v1010_v42 }
 0x3bc   :  { %v1024_v2 = vsub.f32 %v1003_v31, %v1015_v1 }
 0x3be   :  { %v1028_v43 = vmul.f32 %v1145_v38, %v1024_v2 }
 0x3bf   :  { %v1006_v3 = vpop.xlane.xlu0 %1005 }
 0x3c0   :  { %v1013_v46 = vmul.f32 0.0625, %v1006_v3  ;;  %v1032_v6 = vmul.f32 %v1028_v43, %v1028_v43 }
 0x3c2   :  { %v1022_v49 = vsub.f32 %v1001_v61, %v1013_v46  ;;  %1038 = vadd.xlane.f32.xlu0 %v1032_v6 }
 0x3c4   :  { %v1778_v4 = vmul.f32 %v1145_v38, %v1022_v49 }
 0x3c5   :  { %v1012_v51 = vpop.xlane.xlu1 %1011 }
 0x3c6   :  { %v1016_v7 = vmul.f32 0.0625, %v1012_v51  ;;  %v1030_v53 = vmul.f32 %v1778_v4, %v1778_v4 }
 0x3c7   :  { %v1008_v11 = vpop.xlane.xlu0 %1007 }
 0x3c8   :  { %v1025_v56 = vsub.f32 %v1004_v63, %v1016_v7  ;;  %v1014_v8 = vmul.f32 0.0625, %v1008_v11  ;;  %1034 = vadd.xlane.f32.xlu2 %v1030_v53 }
 0x3ca   :  { %v1023_v9 = vsub.f32 %v1002_v40, %v1014_v8  ;;  %v1782_v20 = vmul.f32 %v1145_v38, %v1025_v56 }
 0x3cc   :  { %v1033_v16 = vmul.f32 %v1782_v20, %v1782_v20  ;;  %v1786_v5 = vmul.f32 %v1145_v38, %v1023_v9 }
 0x3ce   :  { %1040 = vadd.xlane.f32.xlu1 %v1033_v16  ;;  %v1031_v21 = vmul.f32 %v1786_v5, %v1786_v5 }
 0x3d0   :  { %1036 = vadd.xlane.f32.xlu2 %v1031_v21 }
 0x435   :  { %v1039_v59 = vpop.xlane.xlu0 %1038 }
 0x436   :  { %v1044_v10 = vmul.f32 0.0625, %v1039_v59 }
 0x438   :  { %v1048_v12 = vadd.f32 1e-05, %v1044_v10 }
 0x43a   :  { %1210 = vrsqrt.f32 %v1048_v12  ;;  %vm1076_vm12 = vweird.f32 %v1048_v12 }
 0x43b   :  { %v1035_v13 = vpop.xlane.xlu2 %1034 }
 0x43c   :  { %v1042_v14 = vmul.f32 0.0625, %v1035_v13 }
 0x43e   :  { %v1046_v17 = vadd.f32 1e-05, %v1042_v14 }
 0x440   :  { %v1211_v18 = vpop.eup %1210  ;;  %1212 = vrsqrt.f32 %v1046_v17  ;;  %vm1056_vm15 = vweird.f32 %v1046_v17 }
 0x441   :  { %v1071_v19 = vmul.f32 %v1211_v18, %v1048_v12  ;;  %v1041_v23 = vpop.xlane.xlu1 %1040  ;;  %vm1077_vm11 = vweird.f32 %v1211_v18 }
 0x442   :  { %v1045_v24 = vmul.f32 0.0625, %v1041_v23  ;;  %vm1078_vm13 = vmor %vm1076_vm12, %vm1077_vm11 }
 0x443   :  { %v1072_v39 = vmul.f32 %v1211_v18, %v1071_v19  ;;  %v1037_v25 = vpop.xlane.xlu2 %1036 }
 0x444   :  { %v1049_v22 = vadd.f32 1e-05, %v1045_v24  ;;  %v1043_v26 = vmul.f32 0.0625, %v1037_v25 }
 0x445   :  { %v1073_v27 = vmul.f32 0.5, %v1072_v39 }
 0x446   :  { %v1213_v28 = vpop.eup %1212  ;;  %1214 = vrsqrt.f32 %v1049_v22  ;;  %v1047_v15 = vadd.f32 1e-05, %v1043_v26  ;;  %vm1086_vm2 = vweird.f32 %v1049_v22 }
 0x447   :  { %v1074_v29 = vsub.f32 1.5, %v1073_v27  ;;  %v1051_v34 = vmul.f32 %v1213_v28, %v1046_v17  ;;  %vm1057_vm14 = vweird.f32 %v1213_v28 }
 0x448   :  { %1216 = vrsqrt.f32 %v1047_v15  ;;  %vm1058_vm0 = vmor %vm1056_vm15, %vm1057_vm14  ;;  %vm1066_vm5 = vweird.f32 %v1047_v15 }
 0x449   :  { %v1075_v44 = vmul.f32 %v1211_v18, %v1074_v29  ;;  %v1052_v45 = vmul.f32 %v1213_v28, %v1051_v34 }
 0x44b   :  { %v1079_v48 = vsel %vm1078_vm13, %v1211_v18, %v1075_v44  ;;  %v1053_v30 = vmul.f32 0.5, %v1052_v45 }
 0x44c   :  { %v1215_v50 = vpop.eup %1214  ;;  %v1092_v54 = vmul.f32 %v1079_v48, %v1028_v43 }
 0x44d   :  { %v1054_v31 = vsub.f32 1.5, %v1053_v30  ;;  %v1081_v32 = vmul.f32 %v1215_v50, %v1049_v22  ;;  %vm1087_vm1 = vweird.f32 %v1215_v50 }
 0x44e   :  { %v1217_v55 = vpop.eup %1216  ;;  %v1100_v33 = vmul.f32 %v1208_v47, %v1092_v54  ;;  %vm1088_vm4 = vmor %vm1086_vm2, %vm1087_vm1 }
 0x44f   :  { %v1055_v35 = vmul.f32 %v1213_v28, %v1054_v31  ;;  %v1082_v57 = vmul.f32 %v1215_v50, %v1081_v32  ;;  %v1061_v41 = vmul.f32 %v1217_v55, %v1047_v15  ;;  %vm1067_vm3 = vweird.f32 %v1217_v55 }
 0x450   :  { %v1108_v58 = vadd.f32 %v1209_v52, %v1100_v33  ;;  %vm1068_vm6 = vmor %vm1066_vm5, %vm1067_vm3 }
 0x451   :  { %v1059_v61 = vsel %vm1058_vm0, %v1213_v28, %v1055_v35  ;;  %v1083_v62 = vmul.f32 0.5, %v1082_v57  ;;  %v1062_v36 = vmul.f32 %v1217_v55, %v1061_v41 }
 0x452   :  { %1112 = vst [vmem:[#allocation11 + $0x10] sm:$0xff] %v1108_v58  ;;  %v1090_v37 = vmul.f32 %v1059_v61, %v1778_v4 }
 0x453   :  { %v1084_v60 = vsub.f32 1.5, %v1083_v62  ;;  %v1063_v63 = vmul.f32 0.5, %v1062_v36 }
 0x454   :  { %v1098_v40 = vmul.f32 %v1208_v47, %v1090_v37 }
 0x455   :  { %v1085_v0 = vmul.f32 %v1215_v50, %v1084_v60  ;;  %v1064_v42 = vsub.f32 1.5, %v1063_v63 }
 0x456   :  { %v1106_v1 = vadd.f32 %v1209_v52, %v1098_v40 }
 0x457   :  { %v1089_v38 = vsel %vm1088_vm4, %v1215_v50, %v1085_v0  ;;  %v1065_v2 = vmul.f32 %v1217_v55, %v1064_v42 }
 0x458   :  { %v1093_v43 = vmul.f32 %v1089_v38, %v1782_v20  ;;  %1110 = vst [vmem:[#allocation11] sm:$0xff] %v1106_v1 }
 0x459   :  { %v1069_v3 = vsel %vm1068_vm6, %v1217_v55, %v1065_v2 }
 0x45a   :  { %v1101_v46 = vmul.f32 %v1208_v47, %v1093_v43  ;;  %v1091_v6 = vmul.f32 %v1069_v3, %v1786_v5 }
 0x45c   :  { %v1109_v49 = vadd.f32 %v1209_v52, %v1101_v46  ;;  %v1099_v4 = vmul.f32 %v1208_v47, %v1091_v6 }
 0x45e   :  { %1113 = vst [vmem:[#allocation11 + $0x18] sm:$0xff] %v1109_v49  ;;  %v1107_v51 = vadd.f32 %v1209_v52, %v1099_v4 }
 0x460   :  { %1111 = vst [vmem:[#allocation11 + $0x8] sm:$0xff] %v1107_v51 }
 0x461   :  { %1126 = dma.vmem_to_hbm [thread:$0]  %s1119_s14, 512, %s1121_s17, [#allocation4], %s1371_s26, %s1371_s26, %s1372_s27  }
 0x462   :  { %1368 = dma.done.wait [#allocation4], 512  }
 0x463   :  { %1369 = vsyncadd [#allocation4], 4294966784 }
 0x464   :  { %1131 = vsyncpa [#allocation3], 1 }
 0x465   :  { %1132 = vsyncpa [#allocation6], 1 }
 0x466   :  { %1133 = vsyncpa [#allocation9], 1 }
 0x467   :  { %1134 = vsyncpa [#allocation4], 1 }

</bundles_post_ra>
